<compile_context>
chip_gen: v7x
topology: tpu7x:2x2x1
jax: 0.10.0
libtpu: 0.0.40
codegen_flags: <defaults>
</compile_context>

<pallas_src>
import functools

import jax
import jax.numpy as jnp
from jax.experimental import pallas as pl
from jax.experimental.pallas import tpu as pltpu

_VMEM_LIMIT = 64 * 1024 * 1024


def _pick_q_tile(T, H, d, BH, budget_bytes=24 * 1024 * 1024):
    """Largest q-tile dividing T (multiple of 8 or T itself) under VMEM budget."""
    E = H * d
    cands = sorted({T, *[t for t in range(8, T + 1, 8) if T % t == 0]},
                   reverse=True)
    for tq in cands:
        blocks = H * tq * 2 * BH + H * T * d + 2 * BH * T + tq * E
        scratch = 4 * tq * T            # transient score/probs per head
        if 4 * (2 * blocks + scratch) <= budget_bytes:
            return tq
    return cands[-1]


# ----------------------------- Pallas kernels ------------------------------

def _head_kernel(x_ref, ent_ref, w_ref, b_ref, ve_ref, abc_ref,
                 *, embed_dim, num_heads, head_dim):
    """Fused conv1D(k=2) + all projections for one batch element.

    x_ref / ent_ref : (1, T, E)         query / entity rows of batch b
    w_ref, b_ref    : (3E, E+3H), (1, E+3H)   pre-composed weights / bias
    ve_ref          : (1, H, T, d)      head-major cat([v, e], -1)
    abc_ref         : (1, T, 3H)        per-head score row vectors [aq|bk|ce]
    """
    x = x_ref[0]                                       # (T, E)
    ent = ent_ref[0]                                   # (T, E)
    # conv1D(kernel=2, padding=1)[..., :T]: needs x[t] and x[t-1]
    x_prev = jnp.concatenate([jnp.zeros_like(x[:1]), x[:-1]], axis=0)
    xx = jnp.concatenate([x, x_prev, ent], axis=-1)    # (T, 3E)
    p = jnp.dot(xx, w_ref[...], preferred_element_type=jnp.float32) + b_ref[...]
    # head-major values (leading-axis indexing downstream; review item #4)
    for h in range(num_heads):                         # static unrolled
        ve_ref[0, h] = p[:, h * head_dim:(h + 1) * head_dim]
    abc_ref[0] = p[:, embed_dim:]                      # (T, 3H)


def _attn_kernel(base_ref, ve_ref, ws_ref, o_ref, *, num_heads, head_dim):
    """Per (batch, q-tile): build score tile in-kernel, softmax, PV.

    base_ref : (1, H, tq, 2*BH)   per-score-row factors (A pattern | one-hot)
    ve_ref   : (1, H, T, d)       head-major values
    ws_ref   : (2*BH, T)          [periodic tiling matrix ; bk - ce_r]
    o_ref    : (1, tq, E)         lane-dense output tile
    """
    ws = ws_ref[...]
    for h in range(num_heads):                         # static unrolled
        # exact scrambled score tile via one tiny MXU matmul (review item #1)
        s = jnp.dot(base_ref[0, h], ws, preferred_element_type=jnp.float32)
        s = jnp.where(s >= 0.0, s, 0.01 * s)           # F.leaky_relu default
        m = jnp.max(s, axis=-1, keepdims=True)
        p = jnp.exp(s - m)
        inv_l = 1.0 / jnp.sum(p, axis=-1, keepdims=True)
        o = jnp.dot(p, ve_ref[0, h], preferred_element_type=jnp.float32)
        # direct static-slice store, deferred softmax norm (review item #6)
        o_ref[0, :, h * head_dim:(h + 1) * head_dim] = o * inv_l


def _tail_kernel(a_ref, w_ref, b_ref, o_ref):
    """Fused deconv1D(k=2)[:T] + out_proj for one batch element."""
    a = a_ref[0]                                       # (T, E)
    a_prev = jnp.concatenate([jnp.zeros_like(a[:1]), a[:-1]], axis=0)
    aa = jnp.concatenate([a, a_prev], axis=-1)         # (T, 2E)
    o_ref[0] = (jnp.dot(aa, w_ref[...], preferred_element_type=jnp.float32)
                + b_ref[...])


# ------------------------------- forward pass -------------------------------

def gat_self_attention_forward(query, entity, p, num_heads):
    """query, entity: (T, B, E) float32.  Returns attn_output (T, B, E)."""
    T, B, E = query.shape
    H = num_heads
    d = E // H
    BH = B * H
    half = E // 2
    f32 = jnp.float32
    No = E + 3 * H

    # ----- weight folding (tiny matmuls, done once per call in XLA) --------
    wq = p["attn_fc_w"][:d]
    wk = p["attn_fc_w"][d:2 * d]
    we = p["attn_fc_w"][2 * d:]
    eyeH = jnp.eye(H, dtype=f32)
    Wq_head = jnp.kron(eyeH, wq.reshape(d, 1))          # (E, H)
    Wk_head = jnp.kron(eyeH, wk.reshape(d, 1))
    We_head = jnp.kron(eyeH, we.reshape(d, 1))
    Wq_top, Wq_bot = Wq_head[:half], Wq_head[half:]
    Wk_top, Wk_bot = Wk_head[:half], Wk_head[half:]

    zEH = jnp.zeros((E, H), f32)
    zEhalf = jnp.zeros((E, half), f32)
    # new_query path -> [ v | 0 | aq_nq | bk_nq | 0 ]
    Wn_big = jnp.concatenate(
        [p["v_w"], zEhalf, p["q_w"] @ Wq_top, p["k_w"] @ Wk_top, zEH], axis=1)
    # raw entity path -> [ 0 | e | aq_e | bk_e | ce ]
    We_big = jnp.concatenate(
        [zEhalf, p["e_w"], p["e_w"] @ Wq_bot, p["e_w"] @ Wk_bot, We_head], axis=1)
    b_big = jnp.concatenate(
        [p["v_b"], p["e_b"],
         p["q_b"] @ Wq_top + p["e_b"] @ Wq_bot + p["attn_fc_b"],  # attn_fc bias
         p["k_b"] @ Wk_top + p["e_b"] @ Wk_bot,
         jnp.zeros((H,), f32)], axis=0)

    # fold the conv1D into the projection weights (review item #9)
    Wc1 = p["conv_w"][:, :, 1].T
    Wc0 = p["conv_w"][:, :, 0].T
    Wall = jnp.concatenate([Wc1 @ Wn_big, Wc0 @ Wn_big, We_big], axis=0)  # (3E, No)
    ball = (p["conv_b"] @ Wn_big + b_big).reshape(1, No)

    # deconv1D + out_proj folded:  y = [a | a_prev] @ Wtail + btail
    Wtail = jnp.concatenate(
        [p["deconv_w"][:, :, 0] @ p["out_w"],
         p["deconv_w"][:, :, 1] @ p["out_w"]], axis=0)                    # (2E, E)
    btail = (p["deconv_b"] @ p["out_w"] + p["out_b"]).reshape(1, E)

    # ----- batch-major layout for clean per-batch blocks --------------------
    q_bte = jnp.transpose(query, (1, 0, 2))             # (B, T, E)
    e_bte = jnp.transpose(entity, (1, 0, 2))

    cp_batch = pltpu.CompilerParams(dimension_semantics=("parallel",),
                                    vmem_limit_bytes=_VMEM_LIMIT)

    ve_hm, abc = pl.pallas_call(
        functools.partial(_head_kernel, embed_dim=E, num_heads=H, head_dim=d),
        out_shape=(jax.ShapeDtypeStruct((B, H, T, d), f32),
                   jax.ShapeDtypeStruct((B, T, 3 * H), f32)),
        grid=(B,),
        in_specs=[
            pl.BlockSpec((1, T, E), lambda b: (b, 0, 0)),    # query
            pl.BlockSpec((1, T, E), lambda b: (b, 0, 0)),    # entity
            pl.BlockSpec((3 * E, No), lambda b: (0, 0)),
            pl.BlockSpec((1, No), lambda b: (0, 0)),
        ],
        out_specs=(pl.BlockSpec((1, H, T, d), lambda b: (b, 0, 0, 0)),
                   pl.BlockSpec((1, T, 3 * H), lambda b: (b, 0, 0))),
        compiler_params=cp_batch,
    )(q_bte, e_bte, Wall, ball)

    # ----- tiny per-row score factors (exact repeat/view "scramble") --------
    aq = jnp.transpose(abc[..., :H], (1, 0, 2)).reshape(T, BH)         # (T, BH)
    bk = jnp.transpose(abc[..., H:2 * H], (0, 2, 1)).reshape(BH, T)    # (BH, T)
    ce = jnp.transpose(abc[..., 2 * H:], (1, 0, 2)).reshape(T, BH)     # (T, BH)
    A = aq + ce                                                        # (T, BH)
    # score row R = n'*T + i'  (i0 = R//BH, s = R%BH):
    #   score[R, j] = A[i0, (s*T + j) % BH] + (bk - ce_r)[s, j]
    sidx = jnp.arange(BH, dtype=jnp.int32)
    cidx = jnp.arange(BH, dtype=jnp.int32)
    nidx = (sidx[:, None] * T + cidx[None, :]) % BH                    # (BH, BH)
    Apat = jnp.take(A, nidx, axis=1)                                   # (T, BH, BH)
    sel = jnp.broadcast_to(jnp.eye(BH, dtype=f32)[None], (T, BH, BH))
    base = jnp.concatenate([Apat, sel], axis=-1).reshape(B, H, T, 2 * BH)
    tilemat = (jnp.arange(T)[None, :] % BH
               == jnp.arange(BH)[:, None]).astype(f32)                 # (BH, T)
    Wscore = jnp.concatenate([tilemat, bk - ce.reshape(BH, T)], axis=0)  # (2BH, T)

    # ----- attention: fused score build + softmax + PV ----------------------
    tq = _pick_q_tile(T, H, d, BH)
    attn = pl.pallas_call(
        functools.partial(_attn_kernel, num_heads=H, head_dim=d),
        out_shape=jax.ShapeDtypeStruct((B, T, E), f32),
        grid=(B, T // tq),
        in_specs=[
            pl.BlockSpec((1, H, tq, 2 * BH), lambda b, qi: (b, 0, qi, 0)),
            pl.BlockSpec((1, H, T, d), lambda b, qi: (b, 0, 0, 0)),
            pl.BlockSpec((2 * BH, T), lambda b, qi: (0, 0)),
        ],
        out_specs=pl.BlockSpec((1, tq, E), lambda b, qi: (b, qi, 0)),
        compiler_params=pltpu.CompilerParams(
            dimension_semantics=("parallel", "parallel"),
            vmem_limit_bytes=_VMEM_LIMIT),
    )(base, ve_hm, Wscore)

    # ----- deconv + out_proj -------------------------------------------------
    y = pl.pallas_call(
        _tail_kernel,
        out_shape=jax.ShapeDtypeStruct((B, T, E), f32),
        grid=(B,),
        in_specs=[
            pl.BlockSpec((1, T, E), lambda b: (b, 0, 0)),
            pl.BlockSpec((2 * E, E), lambda b: (0, 0)),
            pl.BlockSpec((1, E), lambda b: (0, 0)),
        ],
        out_specs=pl.BlockSpec((1, T, E), lambda b: (b, 0, 0)),
        compiler_params=cp_batch,
    )(attn, Wtail, btail)

    # back to the module's Time x Batch x Channel layout; attn_weights is None
    return jnp.transpose(y, (1, 0, 2))


# ----------------------------- params / reference ---------------------------

def init_params(key, embed_dim, num_heads):
    """Deterministic synthetic parameters.  Linear weights stored as (in, out),
    i.e. already transposed relative to PyTorch's (out, in)."""
    E = embed_dim
    d = E // num_heads
    ks = jax.random.split(key, 16)

    def w(k, shape, scale=0.05):
        return scale * jax.random.normal(k, shape, dtype=jnp.float32)

    # NOTE: edge_proj exists in __init__ but is never used in forward -> omitted.
    return {
        "q_w": w(ks[0], (E, E // 2)), "q_b": w(ks[1], (E // 2,)),
        "k_w": w(ks[2], (E, E // 2)), "k_b": w(ks[3], (E // 2,)),
        "v_w": w(ks[4], (E, E // 2)), "v_b": w(ks[5], (E // 2,)),
        "e_w": w(ks[6], (E, E // 2)), "e_b": w(ks[7], (E // 2,)),
        "out_w": w(ks[8], (E, E)),    "out_b": w(ks[9], (E,)),
        "attn_fc_w": w(ks[10], (3 * d,)), "attn_fc_b": w(ks[11], (1,)),
        "conv_w": w(ks[12], (E, E, 2)),   "conv_b": w(ks[13], (E,)),    # (out,in,k)
        "deconv_w": w(ks[14], (E, E, 2)), "deconv_b": w(ks[15], (E,)),  # (in,out,k)
    }


def reference_forward(query, entity, p, num_heads):
    """Pure-jnp reference mirroring the PyTorch forward semantics."""
    T, B, E = query.shape
    d = E // num_heads
    BH = B * num_heads
    zrow = jnp.zeros((1, B, E), jnp.float32)

    q_prev = jnp.concatenate([zrow, query[:-1]], axis=0)
    new_query = (query @ p["conv_w"][:, :, 1].T
                 + q_prev @ p["conv_w"][:, :, 0].T + p["conv_b"])

    e = entity @ p["e_w"] + p["e_b"]
    q = new_query @ p["q_w"] + p["q_b"]
    k = new_query @ p["k_w"] + p["k_b"]
    v = new_query @ p["v_w"] + p["v_b"]

    qe = jnp.concatenate([q, e], axis=2)
    ke = jnp.concatenate([k, e], axis=2)
    ve = jnp.concatenate([v, e], axis=2)

    ke_s = jnp.transpose(ke.reshape(T, BH, d), (1, 0, 2))
    ve_s = jnp.transpose(ve.reshape(T, BH, d), (1, 0, 2))

    edge4 = (entity[:, None, :, :] - entity[None, :, :, :]).reshape(BH, T, T, d)
    qe4 = jnp.broadcast_to(qe.reshape(T, BH, d)[:, None, :, :],
                           (T, T, BH, d)).reshape(BH, T, T, d)
    ke4 = jnp.broadcast_to(ke_s[None, :, :, :],
                           (T, BH, T, d)).reshape(BH, T, T, d)

    z = jnp.concatenate([qe4, ke4, edge4], axis=-1)
    score = jnp.squeeze(z @ p["attn_fc_w"].reshape(3 * d, 1), -1) + p["attn_fc_b"]
    score = jax.nn.leaky_relu(score, negative_slope=0.01)
    probs = jax.nn.softmax(score, axis=-1)
    attn = jnp.einsum("nts,nsd->ntd", probs, ve_s)
    attn = jnp.transpose(attn, (1, 0, 2)).reshape(T, B, E)

    a_prev = jnp.concatenate([zrow, attn[:-1]], axis=0)
    out = (attn @ p["deconv_w"][:, :, 0]
           + a_prev @ p["deconv_w"][:, :, 1] + p["deconv_b"])
    out = out @ p["out_w"] + p["out_b"]
    return out


# ----------------------------------- main ------------------------------------

if __name__ == "__main__":
    key = jax.random.PRNGKey(0)
    embed_dim, num_heads, T, B = 32, 4, 8, 2
    k1, k2, k3 = jax.random.split(key, 3)
    query = jax.random.normal(k1, (T, B, embed_dim), dtype=jnp.float32)
    entity = jax.random.normal(k2, (T, B, embed_dim), dtype=jnp.float32)
    params = init_params(k3, embed_dim, num_heads)

    fwd = jax.jit(functools.partial(gat_self_attention_forward,
                                    num_heads=num_heads))
    out = jax.block_until_ready(fwd(query, entity, params))

    ref = reference_forward(query, entity, params, num_heads)
    assert out.shape == (T, B, embed_dim)
    err = float(jnp.max(jnp.abs(out - ref)))
    assert jnp.allclose(out, ref, atol=2e-4, rtol=2e-4), err
    print("KERNEL_OK")
</pallas_src>

<mosaic_0001>
module attributes {stable_mosaic.version = 11 : i64} {
  func.func @_head_kernel(%arg0: i32, %arg1: memref<1x8x32xf32, #tpu.memory_space<vmem>>, %arg2: memref<1x8x32xf32, #tpu.memory_space<vmem>>, %arg3: memref<96x44xf32, #tpu.memory_space<vmem>>, %arg4: memref<1x44xf32, #tpu.memory_space<vmem>>, %arg5: memref<1x4x8x8xf32, #tpu.memory_space<vmem>>, %arg6: memref<1x8x12xf32, #tpu.memory_space<vmem>>) attributes {dimension_semantics = [#tpu.dimension_semantics<parallel>], iteration_bounds = array<i64: 2>, scalar_prefetch = 0 : i64, scratch_operands = 0 : i64, tpu.core_type = #tpu.core_type<tc>, window_params = [{transform_indices = @transform_0, window_bounds = array<i64: 1, 8, 32>}, {transform_indices = @transform_1, window_bounds = array<i64: 1, 8, 32>}, {pipeline_mode = #tpu.pipeline_mode<synchronous>, transform_indices = @transform_2, window_bounds = array<i64: 96, 44>}, {pipeline_mode = #tpu.pipeline_mode<synchronous>, transform_indices = @transform_3, window_bounds = array<i64: 1, 44>}, {transform_indices = @transform_4, window_bounds = array<i64: 1, 4, 8, 8>}, {transform_indices = @transform_5, window_bounds = array<i64: 1, 8, 12>}]} {
    %c0 = arith.constant 0 : index
    %c0_0 = arith.constant 0 : index
    %c0_1 = arith.constant 0 : index
    %0 = vector.load %arg1[%c0, %c0_0, %c0_1] : memref<1x8x32xf32, #tpu.memory_space<vmem>>, vector<1x8x32xf32>
    %1 = vector.shape_cast %0 : vector<1x8x32xf32> to vector<8x32xf32>
    %c0_2 = arith.constant 0 : index
    %c0_3 = arith.constant 0 : index
    %c0_4 = arith.constant 0 : index
    %2 = vector.load %arg2[%c0_2, %c0_3, %c0_4] : memref<1x8x32xf32, #tpu.memory_space<vmem>>, vector<1x8x32xf32>
    %3 = vector.shape_cast %2 : vector<1x8x32xf32> to vector<8x32xf32>
    %cst = arith.constant 0.000000e+00 : f32
    %4 = vector.broadcast %cst : f32 to vector<1x32xf32>
    %5 = vector.extract_strided_slice %1 {offsets = [0, 0], sizes = [7, 32], strides = [1, 1]} : vector<8x32xf32> to vector<7x32xf32>
    %6 = tpu.concatenate %4, %5 in 0 : vector<1x32xf32>, vector<7x32xf32> -> vector<8x32xf32>
    %7 = tpu.concatenate %1, %6, %3 in 1 : vector<8x32xf32>, vector<8x32xf32>, vector<8x32xf32> -> vector<8x96xf32>
    %c0_5 = arith.constant 0 : index
    %c0_6 = arith.constant 0 : index
    %8 = vector.load %arg3[%c0_5, %c0_6] : memref<96x44xf32, #tpu.memory_space<vmem>>, vector<96x44xf32>
    %cst_7 = arith.constant dense<0.000000e+00> : vector<8x44xf32>
    %9 = tpu.matmul %7, %8, %cst_7 {dimension_numbers = #tpu.dot_dimension_numbers<[1], [0], [0], [1], [0, 0, 1, 1], [], []>} : vector<8x96xf32>, vector<96x44xf32>, vector<8x44xf32> -> vector<8x44xf32>
    %c0_8 = arith.constant 0 : index
    %c0_9 = arith.constant 0 : index
    %10 = vector.load %arg4[%c0_8, %c0_9] : memref<1x44xf32, #tpu.memory_space<vmem>>, vector<1x44xf32>
    %11 = vector.broadcast %10 : vector<1x44xf32> to vector<8x44xf32>
    %12 = arith.addf %9, %11 : vector<8x44xf32>
    %13 = vector.extract_strided_slice %12 {offsets = [0, 0], sizes = [8, 8], strides = [1, 1]} : vector<8x44xf32> to vector<8x8xf32>
    %c0_10 = arith.constant 0 : index
    %c0_11 = arith.constant 0 : index
    %c0_12 = arith.constant 0 : index
    %c0_13 = arith.constant 0 : index
    %14 = vector.load %arg5[%c0_10, %c0_11, %c0_12, %c0_13] : memref<1x4x8x8xf32, #tpu.memory_space<vmem>>, vector<1x1x8x8xf32>
    %15 = vector.shape_cast %14 : vector<1x1x8x8xf32> to vector<8x8xf32>
    %16 = vector.shape_cast %13 : vector<8x8xf32> to vector<1x1x8x8xf32>
    tpu.vector_store %arg5[%c0_10, %c0_11, %c0_12, %c0_13], %16 {strides = array<i32>} : memref<1x4x8x8xf32, #tpu.memory_space<vmem>>, vector<1x1x8x8xf32>,
    %17 = vector.extract_strided_slice %12 {offsets = [0, 8], sizes = [8, 8], strides = [1, 1]} : vector<8x44xf32> to vector<8x8xf32>
    %c0_14 = arith.constant 0 : index
    %c1 = arith.constant 1 : index
    %c0_15 = arith.constant 0 : index
    %c0_16 = arith.constant 0 : index
    %18 = vector.load %arg5[%c0_14, %c1, %c0_15, %c0_16] : memref<1x4x8x8xf32, #tpu.memory_space<vmem>>, vector<1x1x8x8xf32>
    %19 = vector.shape_cast %18 : vector<1x1x8x8xf32> to vector<8x8xf32>
    %20 = vector.shape_cast %17 : vector<8x8xf32> to vector<1x1x8x8xf32>
    tpu.vector_store %arg5[%c0_14, %c1, %c0_15, %c0_16], %20 {strides = array<i32>} : memref<1x4x8x8xf32, #tpu.memory_space<vmem>>, vector<1x1x8x8xf32>,
    %21 = vector.extract_strided_slice %12 {offsets = [0, 16], sizes = [8, 8], strides = [1, 1]} : vector<8x44xf32> to vector<8x8xf32>
    %c0_17 = arith.constant 0 : index
    %c2 = arith.constant 2 : index
    %c0_18 = arith.constant 0 : index
    %c0_19 = arith.constant 0 : index
    %22 = vector.load %arg5[%c0_17, %c2, %c0_18, %c0_19] : memref<1x4x8x8xf32, #tpu.memory_space<vmem>>, vector<1x1x8x8xf32>
    %23 = vector.shape_cast %22 : vector<1x1x8x8xf32> to vector<8x8xf32>
    %24 = vector.shape_cast %21 : vector<8x8xf32> to vector<1x1x8x8xf32>
    tpu.vector_store %arg5[%c0_17, %c2, %c0_18, %c0_19], %24 {strides = array<i32>} : memref<1x4x8x8xf32, #tpu.memory_space<vmem>>, vector<1x1x8x8xf32>,
    %25 = vector.extract_strided_slice %12 {offsets = [0, 24], sizes = [8, 8], strides = [1, 1]} : vector<8x44xf32> to vector<8x8xf32>
    %c0_20 = arith.constant 0 : index
    %c3 = arith.constant 3 : index
    %c0_21 = arith.constant 0 : index
    %c0_22 = arith.constant 0 : index
    %26 = vector.load %arg5[%c0_20, %c3, %c0_21, %c0_22] : memref<1x4x8x8xf32, #tpu.memory_space<vmem>>, vector<1x1x8x8xf32>
    %27 = vector.shape_cast %26 : vector<1x1x8x8xf32> to vector<8x8xf32>
    %28 = vector.shape_cast %25 : vector<8x8xf32> to vector<1x1x8x8xf32>
    tpu.vector_store %arg5[%c0_20, %c3, %c0_21, %c0_22], %28 {strides = array<i32>} : memref<1x4x8x8xf32, #tpu.memory_space<vmem>>, vector<1x1x8x8xf32>,
    %29 = vector.extract_strided_slice %12 {offsets = [0, 32], sizes = [8, 12], strides = [1, 1]} : vector<8x44xf32> to vector<8x12xf32>
    %c0_23 = arith.constant 0 : index
    %c0_24 = arith.constant 0 : index
    %c0_25 = arith.constant 0 : index
    %30 = vector.load %arg6[%c0_23, %c0_24, %c0_25] : memref<1x8x12xf32, #tpu.memory_space<vmem>>, vector<1x8x12xf32>
    %31 = vector.shape_cast %30 : vector<1x8x12xf32> to vector<8x12xf32>
    %32 = vector.shape_cast %29 : vector<8x12xf32> to vector<1x8x12xf32>
    tpu.vector_store %arg6[%c0_23, %c0_24, %c0_25], %32 {strides = array<i32>} : memref<1x8x12xf32, #tpu.memory_space<vmem>>, vector<1x8x12xf32>,
    return
  }
  func.func @transform_0(%arg0: i32) -> (i32, i32, i32) {
    %c0_i32 = arith.constant 0 : i32
    %c0_i32_0 = arith.constant 0 : i32
    %c0_i32_1 = arith.constant 0 : i32
    return %arg0, %c0_i32, %c0_i32_0 : i32, i32, i32
  }
  func.func @transform_1(%arg0: i32) -> (i32, i32, i32) {
    %c0_i32 = arith.constant 0 : i32
    %c0_i32_0 = arith.constant 0 : i32
    %c0_i32_1 = arith.constant 0 : i32
    return %arg0, %c0_i32, %c0_i32_0 : i32, i32, i32
  }
  func.func @transform_2(%arg0: i32) -> (i32, i32) {
    %c0_i32 = arith.constant 0 : i32
    %c0_i32_0 = arith.constant 0 : i32
    %c0_i32_1 = arith.constant 0 : i32
    return %c0_i32, %c0_i32_0 : i32, i32
  }
  func.func @transform_3(%arg0: i32) -> (i32, i32) {
    %c0_i32 = arith.constant 0 : i32
    %c0_i32_0 = arith.constant 0 : i32
    %c0_i32_1 = arith.constant 0 : i32
    return %c0_i32, %c0_i32_0 : i32, i32
  }
  func.func @transform_4(%arg0: i32) -> (i32, i32, i32, i32) {
    %c0_i32 = arith.constant 0 : i32
    %c0_i32_0 = arith.constant 0 : i32
    %c0_i32_1 = arith.constant 0 : i32
    %c0_i32_2 = arith.constant 0 : i32
    return %arg0, %c0_i32, %c0_i32_0, %c0_i32_1 : i32, i32, i32, i32
  }
  func.func @transform_5(%arg0: i32) -> (i32, i32, i32) {
    %c0_i32 = arith.constant 0 : i32
    %c0_i32_0 = arith.constant 0 : i32
    %c0_i32_1 = arith.constant 0 : i32
    return %arg0, %c0_i32, %c0_i32_0 : i32, i32, i32
  }
}

module attributes {stable_mosaic.version = 11 : i64} {
  func.func @_attn_kernel(%arg0: i32, %arg1: i32, %arg2: memref<1x4x8x16xf32, #tpu.memory_space<vmem>>, %arg3: memref<1x4x8x8xf32, #tpu.memory_space<vmem>>, %arg4: memref<16x8xf32, #tpu.memory_space<vmem>>, %arg5: memref<1x8x32xf32, #tpu.memory_space<vmem>>) attributes {dimension_semantics = [#tpu.dimension_semantics<parallel>, #tpu.dimension_semantics<parallel>], iteration_bounds = array<i64: 2, 1>, scalar_prefetch = 0 : i64, scratch_operands = 0 : i64, tpu.core_type = #tpu.core_type<tc>, window_params = [{transform_indices = @transform_0, window_bounds = array<i64: 1, 4, 8, 16>}, {transform_indices = @transform_1, window_bounds = array<i64: 1, 4, 8, 8>}, {pipeline_mode = #tpu.pipeline_mode<synchronous>, transform_indices = @transform_2, window_bounds = array<i64: 16, 8>}, {transform_indices = @transform_3, window_bounds = array<i64: 1, 8, 32>}]} {
    %c0 = arith.constant 0 : index
    %c0_0 = arith.constant 0 : index
    %0 = vector.load %arg4[%c0, %c0_0] : memref<16x8xf32, #tpu.memory_space<vmem>>, vector<16x8xf32>
    %c0_1 = arith.constant 0 : index
    %c0_2 = arith.constant 0 : index
    %c0_3 = arith.constant 0 : index
    %c0_4 = arith.constant 0 : index
    %1 = vector.load %arg2[%c0_1, %c0_2, %c0_3, %c0_4] : memref<1x4x8x16xf32, #tpu.memory_space<vmem>>, vector<1x1x8x16xf32>
    %2 = vector.shape_cast %1 : vector<1x1x8x16xf32> to vector<8x16xf32>
    %cst = arith.constant dense<0.000000e+00> : vector<8x8xf32>
    %3 = tpu.matmul %2, %0, %cst {dimension_numbers = #tpu.dot_dimension_numbers<[1], [0], [0], [1], [0, 0, 1, 1], [], []>} : vector<8x16xf32>, vector<16x8xf32>, vector<8x8xf32> -> vector<8x8xf32>
    %cst_5 = arith.constant 0.000000e+00 : f32
    %4 = vector.broadcast %cst_5 : f32 to vector<8x8xf32>
    %5 = arith.cmpf oge, %3, %4 : vector<8x8xf32>
    %cst_6 = arith.constant 0.00999999977 : f32
    %6 = vector.broadcast %cst_6 : f32 to vector<8x8xf32>
    %7 = arith.mulf %6, %3 : vector<8x8xf32>
    %8 = arith.select %5, %3, %7 : vector<8x8xi1>, vector<8x8xf32>
    %cst_7 = arith.constant dense<0xFF800000> : vector<8xf32>
    %9 = vector.multi_reduction <maximumf>, %8, %cst_7 [1] : vector<8x8xf32> to vector<8xf32>
    %10 = vector.shape_cast %9 : vector<8xf32> to vector<8x1xf32>
    %11 = vector.broadcast %10 : vector<8x1xf32> to vector<8x8xf32>
    %12 = arith.subf %8, %11 : vector<8x8xf32>
    %13 = math.exp %12 : vector<8x8xf32>
    %cst_8 = arith.constant dense<0.000000e+00> : vector<8xf32>
    %14 = vector.multi_reduction <add>, %13, %cst_8 [1] : vector<8x8xf32> to vector<8xf32>
    %15 = vector.shape_cast %14 : vector<8xf32> to vector<8x1xf32>
    %cst_9 = arith.constant 1.000000e+00 : f32
    %16 = vector.broadcast %cst_9 : f32 to vector<8x1xf32>
    %17 = arith.divf %16, %15 : vector<8x1xf32>
    %c0_10 = arith.constant 0 : index
    %c0_11 = arith.constant 0 : index
    %c0_12 = arith.constant 0 : index
    %c0_13 = arith.constant 0 : index
    %18 = vector.load %arg3[%c0_10, %c0_11, %c0_12, %c0_13] : memref<1x4x8x8xf32, #tpu.memory_space<vmem>>, vector<1x1x8x8xf32>
    %19 = vector.shape_cast %18 : vector<1x1x8x8xf32> to vector<8x8xf32>
    %cst_14 = arith.constant dense<0.000000e+00> : vector<8x8xf32>
    %20 = tpu.matmul %13, %19, %cst_14 {dimension_numbers = #tpu.dot_dimension_numbers<[1], [0], [0], [1], [0, 0, 1, 1], [], []>} : vector<8x8xf32>, vector<8x8xf32>, vector<8x8xf32> -> vector<8x8xf32>
    %21 = vector.broadcast %17 : vector<8x1xf32> to vector<8x8xf32>
    %22 = arith.mulf %20, %21 : vector<8x8xf32>
    %c0_15 = arith.constant 0 : index
    %c0_16 = arith.constant 0 : index
    %c0_17 = arith.constant 0 : index
    %23 = vector.load %arg5[%c0_15, %c0_16, %c0_17] : memref<1x8x32xf32, #tpu.memory_space<vmem>>, vector<1x8x8xf32>
    %24 = vector.shape_cast %23 : vector<1x8x8xf32> to vector<8x8xf32>
    %25 = vector.shape_cast %22 : vector<8x8xf32> to vector<1x8x8xf32>
    tpu.vector_store %arg5[%c0_15, %c0_16, %c0_17], %25 {strides = array<i32>} : memref<1x8x32xf32, #tpu.memory_space<vmem>>, vector<1x8x8xf32>,
    %c0_18 = arith.constant 0 : index
    %c1 = arith.constant 1 : index
    %c0_19 = arith.constant 0 : index
    %c0_20 = arith.constant 0 : index
    %26 = vector.load %arg2[%c0_18, %c1, %c0_19, %c0_20] : memref<1x4x8x16xf32, #tpu.memory_space<vmem>>, vector<1x1x8x16xf32>
    %27 = vector.shape_cast %26 : vector<1x1x8x16xf32> to vector<8x16xf32>
    %cst_21 = arith.constant dense<0.000000e+00> : vector<8x8xf32>
    %28 = tpu.matmul %27, %0, %cst_21 {dimension_numbers = #tpu.dot_dimension_numbers<[1], [0], [0], [1], [0, 0, 1, 1], [], []>} : vector<8x16xf32>, vector<16x8xf32>, vector<8x8xf32> -> vector<8x8xf32>
    %cst_22 = arith.constant 0.000000e+00 : f32
    %29 = vector.broadcast %cst_22 : f32 to vector<8x8xf32>
    %30 = arith.cmpf oge, %28, %29 : vector<8x8xf32>
    %cst_23 = arith.constant 0.00999999977 : f32
    %31 = vector.broadcast %cst_23 : f32 to vector<8x8xf32>
    %32 = arith.mulf %31, %28 : vector<8x8xf32>
    %33 = arith.select %30, %28, %32 : vector<8x8xi1>, vector<8x8xf32>
    %cst_24 = arith.constant dense<0xFF800000> : vector<8xf32>
    %34 = vector.multi_reduction <maximumf>, %33, %cst_24 [1] : vector<8x8xf32> to vector<8xf32>
    %35 = vector.shape_cast %34 : vector<8xf32> to vector<8x1xf32>
    %36 = vector.broadcast %35 : vector<8x1xf32> to vector<8x8xf32>
    %37 = arith.subf %33, %36 : vector<8x8xf32>
    %38 = math.exp %37 : vector<8x8xf32>
    %cst_25 = arith.constant dense<0.000000e+00> : vector<8xf32>
    %39 = vector.multi_reduction <add>, %38, %cst_25 [1] : vector<8x8xf32> to vector<8xf32>
    %40 = vector.shape_cast %39 : vector<8xf32> to vector<8x1xf32>
    %cst_26 = arith.constant 1.000000e+00 : f32
    %41 = vector.broadcast %cst_26 : f32 to vector<8x1xf32>
    %42 = arith.divf %41, %40 : vector<8x1xf32>
    %c0_27 = arith.constant 0 : index
    %c1_28 = arith.constant 1 : index
    %c0_29 = arith.constant 0 : index
    %c0_30 = arith.constant 0 : index
    %43 = vector.load %arg3[%c0_27, %c1_28, %c0_29, %c0_30] : memref<1x4x8x8xf32, #tpu.memory_space<vmem>>, vector<1x1x8x8xf32>
    %44 = vector.shape_cast %43 : vector<1x1x8x8xf32> to vector<8x8xf32>
    %cst_31 = arith.constant dense<0.000000e+00> : vector<8x8xf32>
    %45 = tpu.matmul %38, %44, %cst_31 {dimension_numbers = #tpu.dot_dimension_numbers<[1], [0], [0], [1], [0, 0, 1, 1], [], []>} : vector<8x8xf32>, vector<8x8xf32>, vector<8x8xf32> -> vector<8x8xf32>
    %46 = vector.broadcast %42 : vector<8x1xf32> to vector<8x8xf32>
    %47 = arith.mulf %45, %46 : vector<8x8xf32>
    %c0_32 = arith.constant 0 : index
    %c0_33 = arith.constant 0 : index
    %c8 = arith.constant 8 : index
    %48 = vector.load %arg5[%c0_32, %c0_33, %c8] : memref<1x8x32xf32, #tpu.memory_space<vmem>>, vector<1x8x8xf32>
    %49 = vector.shape_cast %48 : vector<1x8x8xf32> to vector<8x8xf32>
    %50 = vector.shape_cast %47 : vector<8x8xf32> to vector<1x8x8xf32>
    tpu.vector_store %arg5[%c0_32, %c0_33, %c8], %50 {strides = array<i32>} : memref<1x8x32xf32, #tpu.memory_space<vmem>>, vector<1x8x8xf32>,
    %c0_34 = arith.constant 0 : index
    %c2 = arith.constant 2 : index
    %c0_35 = arith.constant 0 : index
    %c0_36 = arith.constant 0 : index
    %51 = vector.load %arg2[%c0_34, %c2, %c0_35, %c0_36] : memref<1x4x8x16xf32, #tpu.memory_space<vmem>>, vector<1x1x8x16xf32>
    %52 = vector.shape_cast %51 : vector<1x1x8x16xf32> to vector<8x16xf32>
    %cst_37 = arith.constant dense<0.000000e+00> : vector<8x8xf32>
    %53 = tpu.matmul %52, %0, %cst_37 {dimension_numbers = #tpu.dot_dimension_numbers<[1], [0], [0], [1], [0, 0, 1, 1], [], []>} : vector<8x16xf32>, vector<16x8xf32>, vector<8x8xf32> -> vector<8x8xf32>
    %cst_38 = arith.constant 0.000000e+00 : f32
    %54 = vector.broadcast %cst_38 : f32 to vector<8x8xf32>
    %55 = arith.cmpf oge, %53, %54 : vector<8x8xf32>
    %cst_39 = arith.constant 0.00999999977 : f32
    %56 = vector.broadcast %cst_39 : f32 to vector<8x8xf32>
    %57 = arith.mulf %56, %53 : vector<8x8xf32>
    %58 = arith.select %55, %53, %57 : vector<8x8xi1>, vector<8x8xf32>
    %cst_40 = arith.constant dense<0xFF800000> : vector<8xf32>
    %59 = vector.multi_reduction <maximumf>, %58, %cst_40 [1] : vector<8x8xf32> to vector<8xf32>
    %60 = vector.shape_cast %59 : vector<8xf32> to vector<8x1xf32>
    %61 = vector.broadcast %60 : vector<8x1xf32> to vector<8x8xf32>
    %62 = arith.subf %58, %61 : vector<8x8xf32>
    %63 = math.exp %62 : vector<8x8xf32>
    %cst_41 = arith.constant dense<0.000000e+00> : vector<8xf32>
    %64 = vector.multi_reduction <add>, %63, %cst_41 [1] : vector<8x8xf32> to vector<8xf32>
    %65 = vector.shape_cast %64 : vector<8xf32> to vector<8x1xf32>
    %cst_42 = arith.constant 1.000000e+00 : f32
    %66 = vector.broadcast %cst_42 : f32 to vector<8x1xf32>
    %67 = arith.divf %66, %65 : vector<8x1xf32>
    %c0_43 = arith.constant 0 : index
    %c2_44 = arith.constant 2 : index
    %c0_45 = arith.constant 0 : index
    %c0_46 = arith.constant 0 : index
    %68 = vector.load %arg3[%c0_43, %c2_44, %c0_45, %c0_46] : memref<1x4x8x8xf32, #tpu.memory_space<vmem>>, vector<1x1x8x8xf32>
    %69 = vector.shape_cast %68 : vector<1x1x8x8xf32> to vector<8x8xf32>
    %cst_47 = arith.constant dense<0.000000e+00> : vector<8x8xf32>
    %70 = tpu.matmul %63, %69, %cst_47 {dimension_numbers = #tpu.dot_dimension_numbers<[1], [0], [0], [1], [0, 0, 1, 1], [], []>} : vector<8x8xf32>, vector<8x8xf32>, vector<8x8xf32> -> vector<8x8xf32>
    %71 = vector.broadcast %67 : vector<8x1xf32> to vector<8x8xf32>
    %72 = arith.mulf %70, %71 : vector<8x8xf32>
    %c0_48 = arith.constant 0 : index
    %c0_49 = arith.constant 0 : index
    %c16 = arith.constant 16 : index
    %73 = vector.load %arg5[%c0_48, %c0_49, %c16] : memref<1x8x32xf32, #tpu.memory_space<vmem>>, vector<1x8x8xf32>
    %74 = vector.shape_cast %73 : vector<1x8x8xf32> to vector<8x8xf32>
    %75 = vector.shape_cast %72 : vector<8x8xf32> to vector<1x8x8xf32>
    tpu.vector_store %arg5[%c0_48, %c0_49, %c16], %75 {strides = array<i32>} : memref<1x8x32xf32, #tpu.memory_space<vmem>>, vector<1x8x8xf32>,
    %c0_50 = arith.constant 0 : index
    %c3 = arith.constant 3 : index
    %c0_51 = arith.constant 0 : index
    %c0_52 = arith.constant 0 : index
    %76 = vector.load %arg2[%c0_50, %c3, %c0_51, %c0_52] : memref<1x4x8x16xf32, #tpu.memory_space<vmem>>, vector<1x1x8x16xf32>
    %77 = vector.shape_cast %76 : vector<1x1x8x16xf32> to vector<8x16xf32>
    %cst_53 = arith.constant dense<0.000000e+00> : vector<8x8xf32>
    %78 = tpu.matmul %77, %0, %cst_53 {dimension_numbers = #tpu.dot_dimension_numbers<[1], [0], [0], [1], [0, 0, 1, 1], [], []>} : vector<8x16xf32>, vector<16x8xf32>, vector<8x8xf32> -> vector<8x8xf32>
    %cst_54 = arith.constant 0.000000e+00 : f32
    %79 = vector.broadcast %cst_54 : f32 to vector<8x8xf32>
    %80 = arith.cmpf oge, %78, %79 : vector<8x8xf32>
    %cst_55 = arith.constant 0.00999999977 : f32
    %81 = vector.broadcast %cst_55 : f32 to vector<8x8xf32>
    %82 = arith.mulf %81, %78 : vector<8x8xf32>
    %83 = arith.select %80, %78, %82 : vector<8x8xi1>, vector<8x8xf32>
    %cst_56 = arith.constant dense<0xFF800000> : vector<8xf32>
    %84 = vector.multi_reduction <maximumf>, %83, %cst_56 [1] : vector<8x8xf32> to vector<8xf32>
    %85 = vector.shape_cast %84 : vector<8xf32> to vector<8x1xf32>
    %86 = vector.broadcast %85 : vector<8x1xf32> to vector<8x8xf32>
    %87 = arith.subf %83, %86 : vector<8x8xf32>
    %88 = math.exp %87 : vector<8x8xf32>
    %cst_57 = arith.constant dense<0.000000e+00> : vector<8xf32>
    %89 = vector.multi_reduction <add>, %88, %cst_57 [1] : vector<8x8xf32> to vector<8xf32>
    %90 = vector.shape_cast %89 : vector<8xf32> to vector<8x1xf32>
    %cst_58 = arith.constant 1.000000e+00 : f32
    %91 = vector.broadcast %cst_58 : f32 to vector<8x1xf32>
    %92 = arith.divf %91, %90 : vector<8x1xf32>
    %c0_59 = arith.constant 0 : index
    %c3_60 = arith.constant 3 : index
    %c0_61 = arith.constant 0 : index
    %c0_62 = arith.constant 0 : index
    %93 = vector.load %arg3[%c0_59, %c3_60, %c0_61, %c0_62] : memref<1x4x8x8xf32, #tpu.memory_space<vmem>>, vector<1x1x8x8xf32>
    %94 = vector.shape_cast %93 : vector<1x1x8x8xf32> to vector<8x8xf32>
    %cst_63 = arith.constant dense<0.000000e+00> : vector<8x8xf32>
    %95 = tpu.matmul %88, %94, %cst_63 {dimension_numbers = #tpu.dot_dimension_numbers<[1], [0], [0], [1], [0, 0, 1, 1], [], []>} : vector<8x8xf32>, vector<8x8xf32>, vector<8x8xf32> -> vector<8x8xf32>
    %96 = vector.broadcast %92 : vector<8x1xf32> to vector<8x8xf32>
    %97 = arith.mulf %95, %96 : vector<8x8xf32>
    %c0_64 = arith.constant 0 : index
    %c0_65 = arith.constant 0 : index
    %c24 = arith.constant 24 : index
    %98 = vector.load %arg5[%c0_64, %c0_65, %c24] : memref<1x8x32xf32, #tpu.memory_space<vmem>>, vector<1x8x8xf32>
    %99 = vector.shape_cast %98 : vector<1x8x8xf32> to vector<8x8xf32>
    %100 = vector.shape_cast %97 : vector<8x8xf32> to vector<1x8x8xf32>
    tpu.vector_store %arg5[%c0_64, %c0_65, %c24], %100 {strides = array<i32>} : memref<1x8x32xf32, #tpu.memory_space<vmem>>, vector<1x8x8xf32>,
    return
  }
  func.func @transform_0(%arg0: i32, %arg1: i32) -> (i32, i32, i32, i32) {
    %c0_i32 = arith.constant 0 : i32
    %c0_i32_0 = arith.constant 0 : i32
    %c0_i32_1 = arith.constant 0 : i32
    return %arg0, %c0_i32, %arg1, %c0_i32_0 : i32, i32, i32, i32
  }
  func.func @transform_1(%arg0: i32, %arg1: i32) -> (i32, i32, i32, i32) {
    %c0_i32 = arith.constant 0 : i32
    %c0_i32_0 = arith.constant 0 : i32
    %c0_i32_1 = arith.constant 0 : i32
    %c0_i32_2 = arith.constant 0 : i32
    return %arg0, %c0_i32, %c0_i32_0, %c0_i32_1 : i32, i32, i32, i32
  }
  func.func @transform_2(%arg0: i32, %arg1: i32) -> (i32, i32) {
    %c0_i32 = arith.constant 0 : i32
    %c0_i32_0 = arith.constant 0 : i32
    %c0_i32_1 = arith.constant 0 : i32
    return %c0_i32, %c0_i32_0 : i32, i32
  }
  func.func @transform_3(%arg0: i32, %arg1: i32) -> (i32, i32, i32) {
    %c0_i32 = arith.constant 0 : i32
    %c0_i32_0 = arith.constant 0 : i32
    return %arg0, %arg1, %c0_i32 : i32, i32, i32
  }
}

module attributes {stable_mosaic.version = 11 : i64} {
  func.func @_tail_kernel(%arg0: i32, %arg1: memref<1x8x32xf32, #tpu.memory_space<vmem>>, %arg2: memref<64x32xf32, #tpu.memory_space<vmem>>, %arg3: memref<1x32xf32, #tpu.memory_space<vmem>>, %arg4: memref<1x8x32xf32, #tpu.memory_space<vmem>>) attributes {dimension_semantics = [#tpu.dimension_semantics<parallel>], iteration_bounds = array<i64: 2>, scalar_prefetch = 0 : i64, scratch_operands = 0 : i64, tpu.core_type = #tpu.core_type<tc>, window_params = [{transform_indices = @transform_0, window_bounds = array<i64: 1, 8, 32>}, {pipeline_mode = #tpu.pipeline_mode<synchronous>, transform_indices = @transform_1, window_bounds = array<i64: 64, 32>}, {pipeline_mode = #tpu.pipeline_mode<synchronous>, transform_indices = @transform_2, window_bounds = array<i64: 1, 32>}, {transform_indices = @transform_3, window_bounds = array<i64: 1, 8, 32>}]} {
    %c0 = arith.constant 0 : index
    %c0_0 = arith.constant 0 : index
    %c0_1 = arith.constant 0 : index
    %0 = vector.load %arg1[%c0, %c0_0, %c0_1] : memref<1x8x32xf32, #tpu.memory_space<vmem>>, vector<1x8x32xf32>
    %1 = vector.shape_cast %0 : vector<1x8x32xf32> to vector<8x32xf32>
    %cst = arith.constant 0.000000e+00 : f32
    %2 = vector.broadcast %cst : f32 to vector<1x32xf32>
    %3 = vector.extract_strided_slice %1 {offsets = [0, 0], sizes = [7, 32], strides = [1, 1]} : vector<8x32xf32> to vector<7x32xf32>
    %4 = tpu.concatenate %2, %3 in 0 : vector<1x32xf32>, vector<7x32xf32> -> vector<8x32xf32>
    %5 = tpu.concatenate %1, %4 in 1 : vector<8x32xf32>, vector<8x32xf32> -> vector<8x64xf32>
    %c0_2 = arith.constant 0 : index
    %c0_3 = arith.constant 0 : index
    %6 = vector.load %arg2[%c0_2, %c0_3] : memref<64x32xf32, #tpu.memory_space<vmem>>, vector<64x32xf32>
    %cst_4 = arith.constant dense<0.000000e+00> : vector<8x32xf32>
    %7 = tpu.matmul %5, %6, %cst_4 {dimension_numbers = #tpu.dot_dimension_numbers<[1], [0], [0], [1], [0, 0, 1, 1], [], []>} : vector<8x64xf32>, vector<64x32xf32>, vector<8x32xf32> -> vector<8x32xf32>
    %c0_5 = arith.constant 0 : index
    %c0_6 = arith.constant 0 : index
    %8 = vector.load %arg3[%c0_5, %c0_6] : memref<1x32xf32, #tpu.memory_space<vmem>>, vector<1x32xf32>
    %9 = vector.broadcast %8 : vector<1x32xf32> to vector<8x32xf32>
    %10 = arith.addf %7, %9 : vector<8x32xf32>
    %c0_7 = arith.constant 0 : index
    %c0_8 = arith.constant 0 : index
    %c0_9 = arith.constant 0 : index
    %11 = vector.load %arg4[%c0_7, %c0_8, %c0_9] : memref<1x8x32xf32, #tpu.memory_space<vmem>>, vector<1x8x32xf32>
    %12 = vector.shape_cast %11 : vector<1x8x32xf32> to vector<8x32xf32>
    %13 = vector.shape_cast %10 : vector<8x32xf32> to vector<1x8x32xf32>
    tpu.vector_store %arg4[%c0_7, %c0_8, %c0_9], %13 {strides = array<i32>} : memref<1x8x32xf32, #tpu.memory_space<vmem>>, vector<1x8x32xf32>,
    return
  }
  func.func @transform_0(%arg0: i32) -> (i32, i32, i32) {
    %c0_i32 = arith.constant 0 : i32
    %c0_i32_0 = arith.constant 0 : i32
    %c0_i32_1 = arith.constant 0 : i32
    return %arg0, %c0_i32, %c0_i32_0 : i32, i32, i32
  }
  func.func @transform_1(%arg0: i32) -> (i32, i32) {
    %c0_i32 = arith.constant 0 : i32
    %c0_i32_0 = arith.constant 0 : i32
    %c0_i32_1 = arith.constant 0 : i32
    return %c0_i32, %c0_i32_0 : i32, i32
  }
  func.func @transform_2(%arg0: i32) -> (i32, i32) {
    %c0_i32 = arith.constant 0 : i32
    %c0_i32_0 = arith.constant 0 : i32
    %c0_i32_1 = arith.constant 0 : i32
    return %c0_i32, %c0_i32_0 : i32, i32
  }
  func.func @transform_3(%arg0: i32) -> (i32, i32, i32) {
    %c0_i32 = arith.constant 0 : i32
    %c0_i32_0 = arith.constant 0 : i32
    %c0_i32_1 = arith.constant 0 : i32
    return %arg0, %c0_i32, %c0_i32_0 : i32, i32, i32
  }
}

</mosaic_0001>

<bundles_post_ra>
// kernel: sub.1
= control target key start
LH: loop header
LB: loop body
LE: loop exit
PB: predicated region body
PF: predicated region fallthrough
CT: control target
= control target key end

     0   :  { %s34_s0 = inlined_call_operand.vmem [shape: f32[8,8], index: 0, kind: input, shape index: {}]   ;;  %s35_s1 = inlined_call_operand.vmem [shape: f32[8,8], index: 1, kind: input, shape index: {}]   ;;  %s36_s2 = inlined_call_operand.vmem [shape: f32[8,8], index: 2, kind: output, shape index: {}]  }
   0x1   :  { %v3_v0 = vld [vmem:[%s34_s0] sm:$0xff] }
   0x2   :  { %v4_v1 = vld [vmem:[%s35_s1] sm:$0xff] }
   0x3   :  { %v7_v2 = vsub.f32 %v3_v0, %v4_v1 }
   0x5   :  { %9 = vst [vmem:[%s36_s2] sm:$0xff] %v7_v2 }

// kernel: gat_self_attention_forward.3
= control target key start
LH: loop header
LB: loop body
LE: loop exit
PB: predicated region body
PF: predicated region fallthrough
CT: control target
= control target key end

     0   :  { %s1405_s0 = inlined_call_operand.hbm [shape: f32[2,8,32], index: 0, kind: input, shape index: {}]   ;;  %s1406_s1 = inlined_call_operand.hbm [shape: f32[2,8,32], index: 1, kind: input, shape index: {}]   ;;  %s1407_s2 = inlined_call_operand.hbm [shape: f32[96,44], index: 2, kind: input, shape index: {}]   ;;  %s1408_s3 = inlined_call_operand.hbm [shape: f32[1,44], index: 3, kind: input, shape index: {}]   ;;  %s1409_s4 = inlined_call_operand.hbm [shape: f32[2,4,8,8], index: 4, kind: output, shape index: {0}]   ;;  %s1410_s5 = inlined_call_operand.hbm [shape: f32[2,8,12], index: 5, kind: output, shape index: {1}]  }
   0x1   :  { %1415 = sst [smem:[#allocation19_spill]] %s1407_s2 }
   0x2   :  { %1416 = sst [smem:[#allocation20_spill]] %s1408_s3 }
   0x3   :  { %11 = vsyncpa [#allocation3], 0 }
   0x4   :  { %13 = vsyncpa [#allocation3 + $0x1], 0 }
   0x5   :  { %14 = vsyncpa [#allocation6], 0 }
   0x6   :  { %16 = vsyncpa [#allocation6 + $0x1], 0 }
   0x7   :  { %17 = vsyncpa [#allocation9], 0 }
   0x8   :  { %18 = vsyncpa [#allocation4], 0 }
   0x9   :  { %20 = vsyncpa [#allocation4 + $0x1], 0 }
   0xa   :  { %21 = vsyncpa [#allocation12], 0 }
   0xb   :  { %23 = vsyncpa [#allocation12 + $0x1], 0  ;;  %s1083_s18 = smov 0   ;;  %s1085_s19 = smov 0  }
   0xc   :  { %s1087_s20 = smov 0   ;;  %s1089_s21 = smov 0  }
   0xd LB: > { %s1104_s22 = sadd.s32 4294967295, %s1032_s21   ;;  %s629_s23 = sadd.s32 4294967294, %s1032_s21   ;;  %s1032_s21 = sphi %s1089_s21, %s1438_s21   ;;  %s1028_s20 = sphi %s1087_s20, %s1437_s20   ;;  %s1024_s19 = sphi %s1085_s19, %s1436_s19   ;;  %s1020_s18 = sphi %s1083_s18, %s1435_s18  }
   0xe   : > { %p49_p0 = scmp.ne.s32.totalorder %s1024_s19, %s1020_s18  ;;  %p1411_p1 = scmp.eq.s32.totalorder %s1104_s22, 0 }
   0xf   : > { %p147_p3 = scmp.eq.s32.totalorder %s629_s23, 1  ;;  %p630_p5 = scmp.ge.s32.totalorder %s1032_s21, 1 }
  0x10   : > { %p1113_p4 = por %p1411_p1, %p49_p0  ;;  %p180_p7 = scmp.lt.s32.totalorder %s1032_s21, 3 }
  0x11   : > { %p1118_p6 = por %p147_p3, %p49_p0  ;;  %s1034_s27 = smov [#allocation7]  }
  0x12   : > { %s1417_s24 = scalar_select %p1113_p4, 1, 0 }
  0x13   : > { %s1418_s25 = scalar_select %p1118_p6, 1, 0 }
  0x14   : > { %p1123_p8 = pnand %p630_p5, %p180_p7  ;;  %s192_s28 = sshll.u32 %s1034_s27, 4  ;;  %s1127_s28 = int_to_ptr.vmem [resolvable:$true] %s192_s28 }
  0x15   : > { %s1035_s30 = smov [#allocation8]   ;;  %s1421_s2 = sld [smem:[#allocation19_spill]] }
  0x16   : > { %s1419_s26 = scalar_select %p1123_p8, 1, 0 }
  0x17   : > { %p732_p9 = pneg %p1123_p8  ;;  %s206_s6 = sshll.u32 %s1035_s30, 4  ;;  %s1138_s6 = int_to_ptr.vmem [resolvable:$true] %s206_s6 }
  0x19   : > { %p1134_p11 = pnand %p732_p9, %p1411_p1 }
  0x1b   : > { %s806_s9 = scalar_lea.hbm %s1421_s2, 1536  ;;  %p808_p13 = pneg %p1134_p11 }
  0x1c   : > { %p807_p12 = scmp.ne.s32.totalorder %s1421_s2, %s806_s9  ;;  %p813_p5 = scmp.lt.u32.totalorder %s806_s9, %s1421_s2 }
  0x1e   : > { %p809_p0 = pnand %p808_p13, %p807_p12 }
  0x20   : > { %p810_p3 = pneg %p809_p0 }
  0x22   : > { %p815_p7 = pnand %p813_p5, %p810_p3 }
  0x24   : > { %818 = shalt.err (!%p815_p7)
}
  0x25   : > { %s819_s14 = scalar_lea.vmem %s1127_s28, 1536  ;;  %p827_p2 = scmp.lt.s32.totalorder %s1127_s28, %s1127_s28 }
  0x26   : > { %p820_p9 = scmp.ne.s32.totalorder %s1127_s28, %s819_s14  ;;  %p828_p12 = scmp.lt.s32.totalorder %s819_s14, %s819_s14 }
  0x28   : > { %p822_p10 = pnand %p820_p9, %p808_p13  ;;  %p829_p0 = por %p828_p12, %p827_p2 }
  0x2a   : > { %p823_p1 = pneg %p822_p10 }
  0x2c   : > { %p830_p6 = pnand %p829_p0, %p823_p1 }
  0x2e   : > { %833 = shalt.err (!%p830_p6)
}
  0x2f   : > { %s1036_s15 = smov 128   ;;  %s1037_s16 = smov 8  }
  0x30   : > { %735 = dma.hbm_to_vmem [thread:$0]  (!%p1134_p11), %s1421_s2, 1536, %s1127_s28, [#allocation6], %s1036_s15, %s1036_s15, %s1037_s16  }
  0x31   : > { %s1422_s3 = sld [smem:[#allocation20_spill]] }
  0x37   : > { %s834_s7 = scalar_lea.hbm %s1422_s3, 16 }
  0x38   : > { %p835_p2 = scmp.ne.s32.totalorder %s1422_s3, %s834_s7  ;;  %p841_p10 = scmp.lt.u32.totalorder %s834_s7, %s1422_s3 }
  0x3a   : > { %p837_p1 = pnand %p835_p2, %p808_p13 }
  0x3c   : > { %p838_p6 = pneg %p837_p1 }
  0x3e   : > { %p843_p3 = pnand %p841_p10, %p838_p6 }
  0x40   : > { %846 = shalt.err (!%p843_p3)
}
  0x41   : > { %s847_s28 = scalar_lea.vmem %s1138_s6, 16  ;;  %s854_s12 = scalar_lea.vmem %s1138_s6, 32 }
  0x42   : > { %p848_p5 = scmp.ne.s32.totalorder %s1138_s6, %s847_s28  ;;  %p855_p12 = scmp.lt.s32.totalorder %s1138_s6, %s1138_s6 }
  0x43   : > { %p856_p0 = scmp.lt.s32.totalorder %s854_s12, %s847_s28 }
  0x44   : > { %p850_p7 = pnand %p848_p5, %p808_p13 }
  0x45   : > { %p857_p2 = por %p856_p0, %p855_p12 }
  0x46   : > { %p851_p9 = pneg %p850_p7 }
  0x48   : > { %p858_p1 = pnand %p857_p2, %p851_p9 }
  0x4a   : > { %861 = shalt.err (!%p858_p1)
}
  0x4b   : > { %738 = dma.hbm_to_vmem [thread:$0]  (!%p1134_p11), %s1422_s3, 16, %s1138_s6, [#allocation9]  }
  0x4c   : > { %s1194_s15 = sadd.s32 1, %s1032_s21   ;;  %s36_s29 = sadd.s32 1, %s1028_s20 }
  0x4d   : > { %s33_s16 = ssub.s32 %s1032_s21, %s1194_s15  ;;  %p43_p13 = scmp.ne.s32.totalorder %s1028_s20, %s1024_s19 }
  0x4e   : > { %p34_p6 = scmp.eq.s32.totalorder %s33_s16, 0  ;;  %p44_p10 = scmp.eq.s32.totalorder %s1032_s21, 0 }
  0x4f   : > { %p1423_p3 = scmp.eq.s32.totalorder %s1104_s22, 1  ;;  %p755_p7 = scmp.lt.s32.totalorder %s1032_s21, 2 }
  0x50   : > { %s1210_s23 = scalar_select %p34_p6, %s1028_s20, %s36_s29  }
  0x51   : > { %p1204_p5 = por %p1423_p3, %p43_p13  ;;  %p45_p9 = por %p44_p10, %p43_p13 }
  0x52   : > { %s217_s27 = sand.u32 1, %s1028_s20   ;;  %s635_s30 = sshll.u32 %s1032_s21, 7 }
  0x53   : > { %s1424_s17 = scalar_select %p1204_p5, 1, 0 }
  0x54   : > { %s1213_s6 = sshll.u32 %s217_s27, 3  ;;  %s1219_s9 = scalar_lea.hbm %s1405_s0, %s635_s30 }
  0x55   : > { %s221_s10 = scalar_lea.vmem [#allocation2], %s1213_s6  ;;  %p1224_p11 = pnand %p755_p7, %p45_p9 }
  0x56   : > { %s228_s11 = sshll.u32 %s221_s10, 4  ;;  %s1231_s14 = scalar_lea.hbm %s1406_s1, %s635_s30  ;;  %s1222_s11 = int_to_ptr.vmem [resolvable:$true] %s228_s11 }
  0x57   : > { %s235_s29 = sand.u32 1, %s1032_s21   ;;  %s218_s16 = scalar_lea.sflag [#allocation3], %s217_s27 }
  0x58   : > { %s862_s7 = scalar_lea.hbm %s1219_s9, 128  ;;  %p864_p0 = pneg %p1224_p11 }
  0x59   : > { %p863_p12 = scmp.ne.s32.totalorder %s1219_s9, %s862_s7  ;;  %s867_s2 = scalar_lea.hbm %s1405_s0, 256 }
  0x5a   : > { %p868_p13 = scmp.lt.u32.totalorder %s1219_s9, %s1405_s0  ;;  %p869_p6 = scmp.lt.u32.totalorder %s867_s2, %s862_s7 }
  0x5b   : > { %p865_p2 = pnand %p864_p0, %p863_p12  ;;  %p871_p3 = scmp.lt.u32.totalorder %s862_s7, %s1219_s9 }
  0x5c   : > { %p870_p10 = por %p869_p6, %p868_p13 }
  0x5d   : > { %p866_p1 = pneg %p865_p2 }
  0x5e   : > { %p872_p7 = por %p871_p3, %p870_p10 }
  0x60   : > { %p873_p9 = pnand %p872_p7, %p866_p1 }
  0x62   : > { %876 = shalt.err (!%p873_p9)
}
  0x63   : > { %s877_s27 = scalar_lea.vmem %s1222_s11, 128  ;;  %s1038_s30 = smov [#allocation2]  }
  0x64   : > { %p878_p12 = scmp.ne.s32.totalorder %s1222_s11, %s877_s27  ;;  %s882_s13 = sshll.u32 %s1038_s30, 4  ;;  %s883_s13 = int_to_ptr.vmem [resolvable:$false] %s882_s13 }
  0x65   : > { %s884_s3 = scalar_lea.vmem %s883_s13, 256  ;;  %p885_p4 = scmp.lt.s32.totalorder %s1222_s11, %s883_s13 }
  0x66   : > { %p880_p2 = pnand %p878_p12, %p864_p0  ;;  %p886_p13 = scmp.lt.s32.totalorder %s884_s3, %s877_s27 }
  0x68   : > { %p881_p5 = pneg %p880_p2  ;;  %p887_p6 = por %p886_p13, %p885_p4 }
  0x6a   : > { %p888_p10 = pnand %p887_p6, %p881_p5 }
  0x6c   : > { %891 = shalt.err (!%p888_p10)
}
  0x6d   : > { %742 = dma.hbm_to_vmem [thread:$0]  (!%p1224_p11), %s1219_s9, 128, %s1222_s11, %s218_s16  }
  0x6e   : > { %s239_s2 = scalar_lea.vmem [#allocation5], %s1213_s6  ;;  %s236_s8 = scalar_lea.sflag [#allocation6], %s235_s29 }
  0x6f   : > { %s246_s7 = sshll.u32 %s239_s2, 4  ;;  %s892_s10 = scalar_lea.hbm %s1231_s14, 128  ;;  %s247_s7 = int_to_ptr.vmem [resolvable:$true] %s246_s7 }
  0x70   : > { %p893_p4 = scmp.ne.s32.totalorder %s1231_s14, %s892_s10  ;;  %s897_s30 = scalar_lea.hbm %s1406_s1, 256 }
  0x71   : > { %p898_p3 = scmp.lt.u32.totalorder %s1231_s14, %s1406_s1  ;;  %p899_p7 = scmp.lt.u32.totalorder %s897_s30, %s892_s10 }
  0x72   : > { %p895_p5 = pnand %p893_p4, %p864_p0  ;;  %p901_p12 = scmp.lt.u32.totalorder %s892_s10, %s1231_s14 }
  0x73   : > { %p900_p9 = por %p899_p7, %p898_p3 }
  0x74   : > { %p896_p1 = pneg %p895_p5 }
  0x75   : > { %p902_p2 = por %p901_p12, %p900_p9 }
  0x77   : > { %p903_p13 = pnand %p902_p2, %p896_p1 }
  0x79   : > { %906 = shalt.err (!%p903_p13)
}
  0x7a   : > { %s907_s6 = scalar_lea.vmem %s247_s7, 128  ;;  %s1039_s9 = smov [#allocation5]  }
  0x7b   : > { %p908_p6 = scmp.ne.s32.totalorder %s247_s7, %s907_s6  ;;  %s912_s11 = sshll.u32 %s1039_s9, 4  ;;  %s913_s11 = int_to_ptr.vmem [resolvable:$false] %s912_s11 }
  0x7c   : > { %s914_s29 = scalar_lea.vmem %s913_s11, 256  ;;  %p915_p5 = scmp.lt.s32.totalorder %s247_s7, %s913_s11 }
  0x7d   : > { %p910_p10 = pnand %p908_p6, %p864_p0  ;;  %p916_p8 = scmp.lt.s32.totalorder %s914_s29, %s907_s6 }
  0x7f   : > { %p911_p4 = pneg %p910_p10  ;;  %p917_p3 = por %p916_p8, %p915_p5 }
  0x81   : > { %p918_p7 = pnand %p917_p3, %p911_p4 }
  0x83   : > { %921 = shalt.err (!%p918_p7)
}
  0x84   : > { %745 = dma.hbm_to_vmem [thread:$0]  (!%p1224_p11), %s1231_s14, 128, %s247_s7, %s236_s8  }
  0x85   : > { %p1426_p1 = scmp.ne.s32.totalorder %s1419_s26, 0 }
  0x86   : > { %s1284_s16 = sand.u32 (!%p1426_p1), 1, %s1024_s19   ;;  %p1427_p8 = scmp.ne.s32.totalorder (!%p1426_p1), %s1417_s24, 0 }
  0x87   : > { %255 = sbr.rel (%p1426_p1) target bundleno = 648 (0x288), region = 36  ;;  %s1287_s2 = sshll.u32 (!%p1426_p1), %s1284_s16, 3 }
  0x88   : > { %s258_s10 = scalar_lea.sflag (!%p1426_p1), [#allocation3], %s1284_s16  ;;  %s261_s12 = scalar_lea.vmem (!%p1426_p1), [#allocation2], %s1287_s2 }
  0x8e   : > { %995 = dma.done.wait (%p1427_p8), %s258_s10, 128  }
  0x8f   : > { %997 = vsyncadd (%p1427_p8), %s258_s10, 4294967168  ;;  %s266_s26 = sand.u32 1, %s1104_s22   ;;  %s270_s14 = scalar_lea.vmem [#allocation5], %s1287_s2 }
  0x90   : > { %s267_s28 = scalar_lea.sflag [#allocation6], %s266_s26 }
  0x91   : > { %999 = dma.done.wait (%p1427_p8), %s267_s28, 128  }
  0x92   : > { %1001 = vsyncadd (%p1427_p8), %s267_s28, 4294967168  ;;  %p1428_p11 = scmp.eq.s32.totalorder %s1104_s22, 0 }
  0x94   : > { %1003 = dma.done.wait (%p1428_p11), [#allocation6], 1536   ;;  %p1429_p0 = pmov %p1428_p11 }
  0x96   : > { %1005 = vsyncadd (%p1429_p0), [#allocation6], 4294965760  ;;  %p1430_p9 = pmov %p1429_p0 }
  0x97   : > { %p1431_p12 = pmov %p1429_p0 }
  0x98   : > { %1007 = dma.done.wait (%p1430_p9), [#allocation9], 16  }
  0x99   : > { %1009 = vsyncadd (%p1431_p12), [#allocation9], 4294967280  ;;  %v1040_v0 = vmov 0.0|0.0   ;;  %vm1041_vm0 = vmmov 0   ;;  %v1042_v1 = vmov 0.0   ;;  %v315_v2 = vld [vmem:[%s261_s12] sm:$0xff] }
  0x9a   : > { %698 = vmatprep.subr.bf16.mxu0 %v1040_v0  ;;  %695 = vmatprep.mubr.msk.f32.mxu0 %vm1041_vm0, %v1042_v1  ;;  %vm320_vm1 = vcmask 1040384   ;;  %v334_v3 = vld [vmem:[#allocation7] sm:$0xff]  ;;  %v318_v4 = vrot.slane %v315_v2, 7  ;;  %v335_v5 = vld [vmem:[#allocation7 + $0x8] sm:$0xff]  ;;  %v336_v6 = vld [vmem:[#allocation7 + $0x10] sm:$0xff]  ;;  %s1043_s24 = smov 32  }
  0x9b   : > { %v337_v7 = vld [vmem:[#allocation7 + $0x18] sm:$0xff]  ;;  %v699_v8 = vpack.c.bf16 %v335_v5, %v334_v3  ;;  %v338_v12 = vld [vmem:[#allocation7 + $0x20] sm:$0xff]  ;;  %v339_v13 = vld [vmem:[#allocation7 + $0x28] sm:$0xff]  ;;  %s1044_s7 = smov 64   ;;  %vm330_vm2 = vcmask 261120   ;;  %vm332_vm3 = vcmask 523264  }
  0x9c   : > { %v321_v9 = vsel %vm320_vm1, 0.0, %v318_v4  ;;  %v702_v10 = vpack.c.bf16 %v337_v7, %v336_v6  ;;  %v316_v11 = vld [vmem:[%s270_s14] sm:$0xff]  ;;  %v705_v14 = vpack.c.bf16 %v339_v13, %v338_v12  ;;  %v342_v18 = vld [vmem:[#allocation7 + $0x40] sm:$0xff]  ;;  %v343_v19 = vld [vmem:[#allocation7 + $0x48] sm:$0xff]  ;;  %vm353_vm4 = vcmask 785408   ;;  %s643_s8 = sshll.u32 %s1284_s16, 5 }
  0x9d   : > { %323 = vrot.lane.b32.xlu0 %v321_v9, %s1043_s24  ;;  %700 = vmatpush3.bf16.msra.mxu0 %v699_v8  ;;  %v340_v15 = vld [vmem:[#allocation7 + $0x30] sm:$0xff]  ;;  %v341_v16 = vld [vmem:[#allocation7 + $0x38] sm:$0xff]  ;;  %v711_v20 = vpack.c.bf16 %v343_v19, %v342_v18  ;;  %v645_v28 = vld [vmem:[#allocation8] ss:$0 sm:$0xff]  ;;  %vm427_vm5 = vcmask 64512   ;;  %s1045_s27 = smov 104  }
  0x9e   : > { %701 = vmatprep.subr.bf16.mxu0 %v1040_v0  ;;  %v708_v17 = vpack.c.bf16 %v341_v16, %v340_v15  ;;  %v344_v21 = vld [vmem:[#allocation7 + $0x50] sm:$0xff]  ;;  %v345_v22 = vld [vmem:[#allocation7 + $0x58] sm:$0xff]  ;;  %s1046_s30 = smov 120   ;;  %s307_s13 = scalar_lea.vmem [#allocation10], %s643_s8  ;;  %vm448_vm6 = vcmask 97280  }
  0x9f   : > { %v714_v23 = vpack.c.bf16 %v345_v22, %v344_v21  ;;  %s1047_s3 = smov 112   ;;  %s1048_s6 = smov 96  }
  0xa0   : > { %s469_s9 = sshll.u32 %s307_s13, 4  ;;  %s657_s11 = sshll.u32 %s1104_s22, 9  ;;  %s1312_s9 = int_to_ptr.vmem [resolvable:$true] %s469_s9 }
  0xa1   : > { %327 = vrot.lane.b32.xlu0 %v316_v11, %s1044_s7  ;;  %703 = vmatpush3.bf16.msra.mxu0 %v702_v10  ;;  %s1319_s12 = scalar_lea.hbm %s1409_s4, %s657_s11  ;;  %s654_s26 = sshll.u32 %s1104_s22, 7 }
  0xa2   : > { %704 = vmatprep.subr.bf16.mxu0 %v1040_v0  ;;  %s314_s28 = scalar_lea.vmem [#allocation11], %s1287_s2  ;;  %s451_s24 = scalar_lea.sflag [#allocation4], %s1284_s16 }
  0xa3   : > { %s1325_s14 = sshll.u32 %s314_s28, 4  ;;  %s922_s7 = scalar_lea.vmem %s1312_s9, 512  ;;  %s1360_s14 = int_to_ptr.vmem [resolvable:$true] %s1325_s14 }
  0xa4   : > { %p923_p2 = scmp.ne.s32.totalorder %s1312_s9, %s922_s7  ;;  %p1432_p13 = scmp.ne.s32.totalorder %s1424_s17, 0 }
  0xa5   : > { %706 = vmatpush3.bf16.msra.mxu0 %v705_v14  ;;  %s1049_s8 = smov [#allocation10]  }
  0xa6   : > { %707 = vmatprep.subr.bf16.mxu0 %v1040_v0  ;;  %p924_p6 = pnand %p923_p2, %p1432_p13 }
  0xa8   : > { %p925_p10 = pneg %p924_p6 }
  0xa9   : > { %709 = vmatpush3.bf16.msra.mxu0 %v708_v17 }
  0xaa   : > { %710 = vmatprep.subr.bf16.mxu0 %v1040_v0 }
  0xad   : > { %712 = vmatpush3.bf16.msra.mxu0 %v711_v20 }
  0xae   : > { %713 = vmatprep.subr.bf16.mxu0 %v1040_v0 }
  0xb1   : > { %715 = vmatpush3.bf16.msra.mxu0 %v714_v23 }
 0x10f   : > { %v324_v24 = vpop.permute.xlu0 %323 }
 0x110   : > { %v331_v25 = vsel %vm330_vm2, %v315_v2, %v324_v24 }
 0x113   : > { %v328_v26 = vpop.permute.xlu0 %327 }
 0x114   : > { %v333_v27 = vsel %vm332_vm3, %v331_v25, %v328_v26 }
 0x115   : > { %696 = vmatmul.mubr.msk.f32.vlgmr.msra.gmra.mrb[0].mxu0 %vm353_vm4, %v333_v27 }
 0x1e8   : > { %v423_v29 = vpop.f32.mrb[0].mxu0 }
 0x1e9   : > { %v424_v30 = vadd.f32 %v645_v28, %v423_v29  ;;  %v697_v31 = vpop.f32.mrb[1].mxu0 }
 0x1eb   : > { %440 = vrot.lane.b32.xlu0 %v424_v30, %s1045_s27  ;;  %430 = vrot.lane.b32.xlu1 %v424_v30, %s1046_s30  ;;  %428 = vst.msk [vmem:[%s307_s13] sm:$0xff] %vm427_vm5, %v424_v30  ;;  %s926_s27 = sshll.u32 %s1049_s8, 4  ;;  %s927_s27 = int_to_ptr.vmem [resolvable:$false] %s926_s27 }
 0x1ec   : > { %s928_s30 = scalar_lea.vmem %s927_s27, 1024  ;;  %p929_p4 = scmp.lt.s32.totalorder %s1312_s9, %s927_s27 }
 0x1ed   : > { %p930_p5 = scmp.lt.s32.totalorder %s928_s30, %s922_s7 }
 0x1ef   : > { %435 = vrot.lane.b32.xlu1 %v424_v30, %s1047_s3  ;;  %p931_p3 = por %p930_p5, %p929_p4 }
 0x1f1   : > { %p932_p7 = pnand %p931_p3, %p925_p10 }
 0x1f3   : > { %445 = vrot.lane.b32.xlu1 %v424_v30, %s1048_s6 }
 0x25d   : > { %v441_v32 = vpop.permute.xlu0 %440  ;;  %v431_v33 = vpop.permute.xlu1 %430 }
 0x25e   : > { %649 = vst.msk [vmem:[%s307_s13 + $0x18] sm:$0xff] %vm427_vm5, %v441_v32  ;;  %647 = vst.msk [vmem:[%s307_s13 + $0x8] sm:$0xff] %vm427_vm5, %v431_v33 }
 0x261   : > { %v436_v34 = vpop.permute.xlu1 %435 }
 0x262   : > { %648 = vst.msk [vmem:[%s307_s13 + $0x10] sm:$0xff] %vm427_vm5, %v436_v34 }
 0x263   : > { %935 = shalt.err (!%p932_p7)
}
 0x264   : > { %s936_s13 = scalar_lea.hbm %s1319_s12, 512  ;;  %s940_s11 = scalar_lea.hbm %s1409_s4, 1024 }
 0x265   : > { %p937_p1 = scmp.ne.s32.totalorder %s1319_s12, %s936_s13  ;;  %p941_p0 = scmp.lt.u32.totalorder %s1319_s12, %s1409_s4 }
 0x266   : > { %p942_p9 = scmp.lt.u32.totalorder %s940_s11, %s936_s13  ;;  %p944_p2 = scmp.lt.u32.totalorder %s936_s13, %s1319_s12 }
 0x267   : > { %p938_p8 = pnand %p937_p1, %p1432_p13 }
 0x268   : > { %p943_p12 = por %p942_p9, %p941_p0 }
 0x269   : > { %p939_p11 = pneg %p938_p8 }
 0x26a   : > { %p945_p6 = por %p944_p2, %p943_p12 }
 0x26c   : > { %p946_p10 = pnand %p945_p6, %p939_p11 }
 0x26e   : > { %949 = shalt.err (!%p946_p10)
}
 0x26f   : > { %s1050_s7 = smov 128   ;;  %s1051_s8 = smov 8   ;;  %v446_v35 = vpop.permute.xlu1 %445 }
 0x270   : > { %728 = dma.vmem_to_hbm [thread:$0]  (%p1432_p13), %s1312_s9, 512, %s1319_s12, %s451_s24, %s1050_s7, %s1050_s7, %s1051_s8  }
 0x271   : > { %s1357_s13 = scalar_lea.hbm %s1410_s5, %s654_s26  ;;  %449 = vst.msk [vmem:[%s314_s28] sm:$0xff] %vm448_vm6, %v446_v35  ;;  %s456_s3 = scalar_lea.sflag [#allocation12], %s1284_s16 }
 0x272   : > { %s950_s6 = scalar_lea.vmem %s1360_s14, 128  ;;  %s1052_s22 = smov [#allocation11]  }
 0x273   : > { %p951_p4 = scmp.ne.s32.totalorder %s1360_s14, %s950_s6  ;;  %s954_s9 = sshll.u32 %s1052_s22, 4  ;;  %s955_s9 = int_to_ptr.vmem [resolvable:$false] %s954_s9 }
 0x274   : > { %s956_s12 = scalar_lea.vmem %s955_s9, 256  ;;  %p957_p7 = scmp.lt.s32.totalorder %s1360_s14, %s955_s9 }
 0x275   : > { %p952_p5 = pnand %p951_p4, %p1432_p13  ;;  %p958_p1 = scmp.lt.s32.totalorder %s956_s12, %s950_s6 }
 0x277   : > { %p953_p3 = pneg %p952_p5  ;;  %p959_p8 = por %p958_p1, %p957_p7 }
 0x279   : > { %p960_p11 = pnand %p959_p8, %p953_p3 }
 0x27b   : > { %963 = shalt.err (!%p960_p11)
}
 0x27c   : > { %s964_s16 = scalar_lea.hbm %s1357_s13, 128  ;;  %s968_s28 = scalar_lea.hbm %s1410_s5, 256 }
 0x27d   : > { %p965_p0 = scmp.ne.s32.totalorder %s1357_s13, %s964_s16  ;;  %p969_p2 = scmp.lt.u32.totalorder %s1357_s13, %s1410_s5 }
 0x27e   : > { %p970_p6 = scmp.lt.u32.totalorder %s968_s28, %s964_s16  ;;  %p972_p4 = scmp.lt.u32.totalorder %s964_s16, %s1357_s13 }
 0x27f   : > { %p966_p9 = pnand %p965_p0, %p1432_p13 }
 0x280   : > { %p971_p10 = por %p970_p6, %p969_p2 }
 0x281   : > { %p967_p12 = pneg %p966_p9 }
 0x282   : > { %p973_p5 = por %p972_p4, %p971_p10 }
 0x284   : > { %p974_p3 = pnand %p973_p5, %p967_p12 }
 0x286   : > { %977 = shalt.err (!%p974_p3)
}
 0x287   : > { %729 = dma.vmem_to_hbm [thread:$0]  (%p1432_p13), %s1360_s14, 128, %s1357_s13, %s456_s3  }
 0x288 PF: > { %s497_s29 = sand.u32 1, %s1020_s18   ;;  %p1433_p7 = scmp.ne.s32.totalorder %s1418_s25, 0 }
 0x289   : > { %p1434_p1 = scmp.ge.s32.totalorder %s1032_s21, 2  ;;  %s498_s10 = scalar_lea.sflag [#allocation4], %s497_s29 }
 0x28b   : > { %p747_p8 = pnand %p1434_p1, %p1433_p7 }
 0x28d   : > { %1011 = dma.done.wait (!%p747_p8), %s498_s10, 512  }
 0x28e   : > { %1013 = vsyncadd (!%p747_p8), %s498_s10, 4294966784  ;;  %s507_s7 = scalar_lea.sflag [#allocation12], %s497_s29 }
 0x28f   : > { %1015 = dma.done.wait (!%p747_p8), %s507_s7, 128  }
 0x290   : > { %1017 = vsyncadd (!%p747_p8), %s507_s7, 4294967168  ;;  %p26_p13 = scmp.ge.s32.totalorder %s1194_s15, 4   ;;  %s1435_s18 = smov %s1024_s19 }
 0x291   : > { %s1436_s19 = smov %s1028_s20  ;;  %s1437_s20 = smov %s1210_s23 }
 0x292   : > { %s1438_s21 = smov %s1194_s15  ;;  %28 = sbr.rel (!%p26_p13) target bundleno = 13 (0xd), region = 122 }
 0x299   :  { %512 = vsyncpa [#allocation3], 1 }
 0x29a   :  { %514 = vsyncpa [#allocation3 + $0x1], 1 }
 0x29b   :  { %515 = vsyncpa [#allocation6], 1 }
 0x29c   :  { %517 = vsyncpa [#allocation6 + $0x1], 1 }
 0x29d   :  { %518 = vsyncpa [#allocation9], 1 }
 0x29e   :  { %519 = vsyncpa [#allocation4], 1 }
 0x29f   :  { %521 = vsyncpa [#allocation4 + $0x1], 1 }
 0x2a0   :  { %522 = vsyncpa [#allocation12], 1 }
 0x2a1   :  { %524 = vsyncpa [#allocation12 + $0x1], 1 }

// kernel: gat_self_attention_forward.5
= control target key start
LH: loop header
LB: loop body
LE: loop exit
PB: predicated region body
PF: predicated region fallthrough
CT: control target
= control target key end

     0   :  { %8 = vsyncpa [#allocation3], 0  ;;  %s971_s0 = inlined_call_operand.hbm [shape: f32[2,8,32], index: 0, kind: input, shape index: {}]   ;;  %s972_s1 = inlined_call_operand.hbm [shape: f32[64,32], index: 1, kind: input, shape index: {}]   ;;  %s973_s2 = inlined_call_operand.hbm [shape: f32[1,32], index: 2, kind: input, shape index: {}]   ;;  %s974_s3 = inlined_call_operand.hbm [shape: f32[2,8,32], index: 3, kind: output, shape index: {}]  }
   0x1   :  { %10 = vsyncpa [#allocation3 + $0x1], 0 }
   0x2   :  { %11 = vsyncpa [#allocation6], 0 }
   0x3   :  { %12 = vsyncpa [#allocation4], 0 }
   0x4   :  { %14 = vsyncpa [#allocation4 + $0x1], 0  ;;  %s737_s12 = smov 0   ;;  %s739_s13 = smov 0  }
   0x5   :  { %s741_s14 = smov 0   ;;  %s743_s15 = smov 0  }
   0x6 LB: > { %s758_s16 = sadd.s32 4294967295, %s705_s15   ;;  %s418_s17 = sadd.s32 4294967294, %s705_s15   ;;  %s705_s15 = sphi %s743_s15, %s994_s15   ;;  %s701_s14 = sphi %s741_s14, %s993_s14   ;;  %s697_s13 = sphi %s739_s13, %s992_s13   ;;  %s693_s12 = sphi %s737_s12, %s991_s12  }
   0x7   : > { %p40_p0 = scmp.ne.s32.totalorder %s697_s13, %s693_s12  ;;  %p975_p1 = scmp.eq.s32.totalorder %s758_s16, 0 }
   0x8   : > { %p112_p3 = scmp.eq.s32.totalorder %s418_s17, 1  ;;  %p419_p5 = scmp.ge.s32.totalorder %s705_s15, 1 }
   0x9   : > { %p767_p4 = por %p975_p1, %p40_p0  ;;  %p119_p7 = scmp.lt.s32.totalorder %s705_s15, 3 }
   0xa   : > { %p772_p6 = por %p112_p3, %p40_p0  ;;  %s707_s21 = smov [#allocation5]  }
   0xb   : > { %s978_s18 = scalar_select %p767_p4, 1, 0 }
   0xc   : > { %s979_s19 = scalar_select %p772_p6, 1, 0 }
   0xd   : > { %p777_p8 = pnand %p419_p5, %p119_p7  ;;  %s131_s22 = sshll.u32 %s707_s21, 4  ;;  %s781_s22 = int_to_ptr.vmem [resolvable:$true] %s131_s22 }
   0xe   : > { %s708_s24 = smov [#allocation7]   ;;  %s549_s28 = scalar_lea.hbm %s972_s1, 1024 }
   0xf   : > { %p488_p9 = pneg %p777_p8  ;;  %s145_s25 = sshll.u32 %s708_s24, 4  ;;  %s792_s25 = int_to_ptr.vmem [resolvable:$true] %s145_s25 }
  0x10   : > { %p550_p12 = scmp.ne.s32.totalorder %s972_s1, %s549_s28  ;;  %p556_p5 = scmp.lt.u32.totalorder %s549_s28, %s972_s1 }
  0x11   : > { %p788_p11 = pnand %p488_p9, %p975_p1 }
  0x13   : > { %p551_p13 = pneg %p788_p11 }
  0x15   : > { %p552_p0 = pnand %p551_p13, %p550_p12 }
  0x17   : > { %p553_p3 = pneg %p552_p0 }
  0x19   : > { %p558_p7 = pnand %p556_p5, %p553_p3 }
  0x1b   : > { %561 = shalt.err (!%p558_p7)
}
  0x1c   : > { %s562_s6 = scalar_lea.vmem %s781_s22, 1024  ;;  %p570_p2 = scmp.lt.s32.totalorder %s781_s22, %s781_s22 }
  0x1d   : > { %p563_p9 = scmp.ne.s32.totalorder %s781_s22, %s562_s6  ;;  %p571_p12 = scmp.lt.s32.totalorder %s562_s6, %s562_s6 }
  0x1f   : > { %p565_p10 = pnand %p563_p9, %p551_p13  ;;  %p572_p0 = por %p571_p12, %p570_p2 }
  0x21   : > { %p566_p1 = pneg %p565_p10 }
  0x23   : > { %p573_p6 = pnand %p572_p0, %p566_p1 }
  0x25   : > { %576 = shalt.err (!%p573_p6)
}
  0x26   : > { %s709_s7 = smov 128   ;;  %s710_s8 = smov 8  }
  0x27   : > { %491 = dma.hbm_to_vmem [thread:$0]  (!%p788_p11), %s972_s1, 1024, %s781_s22, [#allocation6], %s709_s7, %s709_s7, %s710_s8  }
  0x28   : > { %s577_s21 = scalar_lea.hbm %s973_s2, 16 }
  0x29   : > { %p578_p2 = scmp.ne.s32.totalorder %s973_s2, %s577_s21  ;;  %p584_p10 = scmp.lt.u32.totalorder %s577_s21, %s973_s2 }
  0x2b   : > { %p580_p1 = pnand %p578_p2, %p551_p13 }
  0x2d   : > { %p581_p6 = pneg %p580_p1 }
  0x2f   : > { %p586_p3 = pnand %p584_p10, %p581_p6 }
  0x31   : > { %589 = shalt.err (!%p586_p3)
}
  0x32   : > { %s590_s22 = scalar_lea.vmem %s792_s25, 16  ;;  %s597_s29 = scalar_lea.vmem %s792_s25, 32 }
  0x33   : > { %p591_p5 = scmp.ne.s32.totalorder %s792_s25, %s590_s22  ;;  %p598_p12 = scmp.lt.s32.totalorder %s792_s25, %s792_s25 }
  0x34   : > { %p599_p0 = scmp.lt.s32.totalorder %s597_s29, %s590_s22 }
  0x35   : > { %p593_p7 = pnand %p591_p5, %p551_p13 }
  0x36   : > { %p600_p2 = por %p599_p0, %p598_p12 }
  0x37   : > { %p594_p9 = pneg %p593_p7 }
  0x39   : > { %p601_p1 = pnand %p600_p2, %p594_p9 }
  0x3b   : > { %604 = shalt.err (!%p601_p1)
}
  0x3c   : > { %494 = dma.hbm_to_vmem [thread:$0]  (!%p788_p11), %s973_s2, 16, %s792_s25, [#allocation6]  }
  0x3d   : > { %s848_s5 = sadd.s32 1, %s705_s15   ;;  %s27_s23 = sadd.s32 1, %s701_s14 }
  0x3e   : > { %s24_s6 = ssub.s32 %s705_s15, %s848_s5  ;;  %p34_p13 = scmp.ne.s32.totalorder %s701_s14, %s697_s13 }
  0x3f   : > { %p25_p6 = scmp.eq.s32.totalorder %s24_s6, 0  ;;  %p35_p10 = scmp.eq.s32.totalorder %s705_s15, 0 }
  0x40   : > { %p982_p3 = scmp.eq.s32.totalorder %s758_s16, 1  ;;  %p505_p7 = scmp.lt.s32.totalorder %s705_s15, 2 }
  0x41   : > { %s864_s8 = scalar_select %p25_p6, %s701_s14, %s27_s23  }
  0x42   : > { %p858_p5 = por %p982_p3, %p34_p13  ;;  %p36_p9 = por %p35_p10, %p34_p13 }
  0x43   : > { %s156_s9 = sand.u32 1, %s701_s14   ;;  %s424_s25 = sshll.u32 %s705_s15, 7 }
  0x44   : > { %s983_s7 = scalar_select %p858_p5, 1, 0 }
  0x45   : > { %s423_s10 = sshll.u32 %s156_s9, 3  ;;  %s871_s21 = scalar_lea.hbm %s971_s0, %s424_s25 }
  0x46   : > { %s160_s24 = scalar_lea.vmem [#allocation2], %s423_s10  ;;  %p875_p11 = pnand %p505_p7, %p36_p9 }
  0x47   : > { %s167_s26 = sshll.u32 %s160_s24, 4  ;;  %s157_s28 = scalar_lea.sflag [#allocation3], %s156_s9  ;;  %s873_s26 = int_to_ptr.vmem [resolvable:$true] %s167_s26 }
  0x48   : > { %s605_s22 = scalar_lea.hbm %s871_s21, 128  ;;  %p607_p0 = pneg %p875_p11 }
  0x49   : > { %p606_p12 = scmp.ne.s32.totalorder %s871_s21, %s605_s22  ;;  %s610_s4 = scalar_lea.hbm %s971_s0, 256 }
  0x4a   : > { %p611_p13 = scmp.lt.u32.totalorder %s871_s21, %s971_s0  ;;  %p612_p6 = scmp.lt.u32.totalorder %s610_s4, %s605_s22 }
  0x4b   : > { %p608_p2 = pnand %p607_p0, %p606_p12  ;;  %p614_p3 = scmp.lt.u32.totalorder %s605_s22, %s871_s21 }
  0x4c   : > { %p613_p10 = por %p612_p6, %p611_p13 }
  0x4d   : > { %p609_p1 = pneg %p608_p2 }
  0x4e   : > { %p615_p7 = por %p614_p3, %p613_p10 }
  0x50   : > { %p616_p9 = pnand %p615_p7, %p609_p1 }
  0x52   : > { %619 = shalt.err (!%p616_p9)
}
  0x53   : > { %s620_s9 = scalar_lea.vmem %s873_s26, 128  ;;  %s711_s10 = smov [#allocation2]  }
  0x54   : > { %p621_p12 = scmp.ne.s32.totalorder %s873_s26, %s620_s9  ;;  %s625_s25 = sshll.u32 %s711_s10, 4  ;;  %s626_s25 = int_to_ptr.vmem [resolvable:$false] %s625_s25 }
  0x55   : > { %s627_s11 = scalar_lea.vmem %s626_s25, 256  ;;  %p628_p4 = scmp.lt.s32.totalorder %s873_s26, %s626_s25 }
  0x56   : > { %p623_p2 = pnand %p621_p12, %p607_p0  ;;  %p629_p13 = scmp.lt.s32.totalorder %s627_s11, %s620_s9 }
  0x58   : > { %p624_p5 = pneg %p623_p2  ;;  %p630_p6 = por %p629_p13, %p628_p4 }
  0x5a   : > { %p631_p10 = pnand %p630_p6, %p624_p5 }
  0x5c   : > { %634 = shalt.err (!%p631_p10)
}
  0x5d   : > { %498 = dma.hbm_to_vmem [thread:$0]  (!%p875_p11), %s871_s21, 128, %s873_s26, %s157_s28  }
  0x5e   : > { %176 = sbr.rel (%p777_p8) target bundleno = 453 (0x1c5), region = 32  ;;  %s907_s17 = sand.u32 (!%p777_p8), 1, %s697_s13  }
  0x5f   : > { %s426_s24 = sshll.u32 (!%p777_p8), %s907_s17, 3  ;;  %s179_s22 = scalar_lea.sflag (!%p777_p8), [#allocation3], %s907_s17 }
  0x60   : > { %s182_s29 = scalar_lea.vmem (!%p777_p8), [#allocation2], %s426_s24  ;;  %p985_p4 = scmp.ne.s32.totalorder (!%p777_p8), %s978_s18, 0 }
  0x65   : > { %680 = dma.done.wait (%p985_p4), %s179_s22, 128  }
  0x66   : > { %682 = vsyncadd (%p985_p4), %s179_s22, 4294967168  ;;  %p986_p5 = scmp.eq.s32.totalorder %s758_s16, 0 }
  0x68   : > { %684 = dma.done.wait (%p986_p5), [#allocation6], 1040   ;;  %p987_p8 = pmov %p986_p5 }
  0x69   : > { %v712_v0 = vmov 0.0|0.0   ;;  %vm713_vm0 = vmmov 0   ;;  %v714_v1 = vmov 0.0   ;;  %v213_v2 = vld [vmem:[%s182_s29] sm:$0xff]  ;;  %vm217_vm1 = vcmask 1040384   ;;  %v225_v3 = vld [vmem:[#allocation5] sm:$0xff] }
  0x6a   : > { %686 = vsyncadd (%p987_p8), [#allocation6], 4294966256  ;;  %464 = vmatprep.subr.bf16.mxu0 %v712_v0  ;;  %461 = vmatprep.mubr.msk.f32.mxu0 %vm713_vm0, %v714_v1  ;;  %v226_v4 = vld [vmem:[#allocation5 + $0x8] sm:$0xff]  ;;  %v215_v5 = vrot.slane %v213_v2, 7  ;;  %v227_v7 = vld [vmem:[#allocation5 + $0x10] sm:$0xff]  ;;  %s715_s18 = smov 32  }
  0x6b   : > { %v465_v6 = vpack.c.bf16 %v226_v4, %v225_v3  ;;  %v228_v8 = vld [vmem:[#allocation5 + $0x18] sm:$0xff]  ;;  %v229_v11 = vld [vmem:[#allocation5 + $0x20] sm:$0xff]  ;;  %v230_v12 = vld [vmem:[#allocation5 + $0x28] sm:$0xff]  ;;  %vm223_vm2 = vcmask 261120   ;;  %vm240_vm3 = vcmask 523264   ;;  %s433_s20 = sshll.u32 %s758_s16, 7 }
  0x6c   : > { %v218_v9 = vsel %vm217_vm1, 0.0, %v215_v5  ;;  %v468_v10 = vpack.c.bf16 %v228_v8, %v227_v7  ;;  %v471_v13 = vpack.c.bf16 %v230_v12, %v229_v11  ;;  %v231_v14 = vld [vmem:[#allocation5 + $0x30] sm:$0xff]  ;;  %v232_v15 = vld [vmem:[#allocation5 + $0x38] sm:$0xff]  ;;  %v430_v19 = vld [vmem:[#allocation7] ss:$0 sm:$0xff]  ;;  %s212_s21 = scalar_lea.vmem [#allocation8], %s426_s24  ;;  %s927_s30 = scalar_lea.hbm %s974_s3, %s433_s20 }
  0x6d   : > { %466 = vmatpush3.bf16.msra.mxu0 %v465_v6  ;;  %220 = vrot.lane.b32.xlu0 %v218_v9, %s715_s18  ;;  %v474_v16 = vpack.c.bf16 %v232_v15, %v231_v14  ;;  %s329_s26 = sshll.u32 %s212_s21, 4  ;;  %s316_s4 = scalar_lea.sflag [#allocation4], %s907_s17  ;;  %s929_s26 = int_to_ptr.vmem [resolvable:$true] %s329_s26 }
  0x6e   : > { %467 = vmatprep.subr.bf16.mxu0 %v712_v0  ;;  %s635_s23 = scalar_lea.vmem %s929_s26, 128  ;;  %p988_p0 = scmp.ne.s32.totalorder %s983_s7, 0 }
  0x6f   : > { %p636_p11 = scmp.ne.s32.totalorder %s929_s26, %s635_s23  ;;  %s716_s16 = smov [#allocation8]  }
  0x70   : > { %s639_s6 = sshll.u32 %s716_s16, 4  ;;  %s640_s6 = int_to_ptr.vmem [resolvable:$false] %s639_s6 }
  0x71   : > { %469 = vmatpush3.bf16.msra.mxu0 %v468_v10  ;;  %p637_p1 = pnand %p636_p11, %p988_p0  ;;  %s641_s9 = scalar_lea.vmem %s640_s6, 256 }
  0x72   : > { %470 = vmatprep.subr.bf16.mxu0 %v712_v0  ;;  %p642_p7 = scmp.lt.s32.totalorder %s929_s26, %s640_s6  ;;  %p643_p9 = scmp.lt.s32.totalorder %s641_s9, %s635_s23 }
  0x73   : > { %p638_p3 = pneg %p637_p1 }
  0x74   : > { %p644_p12 = por %p643_p9, %p642_p7 }
  0x75   : > { %472 = vmatpush3.bf16.msra.mxu0 %v471_v13 }
  0x76   : > { %473 = vmatprep.subr.bf16.mxu0 %v712_v0  ;;  %p645_p2 = pnand %p644_p12, %p638_p3 }
  0x79   : > { %475 = vmatpush3.bf16.msra.mxu0 %v474_v16 }
  0xdf   : > { %v221_v17 = vpop.permute.xlu0 %220 }
  0xe0   : > { %v224_v18 = vsel %vm223_vm2, %v213_v2, %v221_v17 }
  0xe1   : > { %462 = vmatmul.mubr.msk.f32.vlgmr.msra.gmra.mrb[0].mxu0 %vm240_vm3, %v224_v18 }
 0x1b4   : > { %v310_v20 = vpop.f32.mrb[0].mxu0 }
 0x1b5   : > { %v311_v21 = vadd.f32 %v430_v19, %v310_v20  ;;  %v463_v22 = vpop.f32.mrb[1].mxu0 }
 0x1b7   : > { %314 = vst.msk [vmem:[%s212_s21] sm:$0xff] %vm223_vm2, %v311_v21 }
 0x1b8   : > { %648 = shalt.err (!%p645_p2)
}
 0x1b9   : > { %s649_s10 = scalar_lea.hbm %s927_s30, 128  ;;  %s653_s17 = scalar_lea.hbm %s974_s3, 256 }
 0x1ba   : > { %p650_p13 = scmp.ne.s32.totalorder %s927_s30, %s649_s10  ;;  %p654_p4 = scmp.lt.u32.totalorder %s927_s30, %s974_s3 }
 0x1bb   : > { %p655_p5 = scmp.lt.u32.totalorder %s653_s17, %s649_s10  ;;  %p657_p11 = scmp.lt.u32.totalorder %s649_s10, %s927_s30 }
 0x1bc   : > { %p651_p6 = pnand %p650_p13, %p988_p0 }
 0x1bd   : > { %p656_p8 = por %p655_p5, %p654_p4 }
 0x1be   : > { %p652_p10 = pneg %p651_p6 }
 0x1bf   : > { %p658_p1 = por %p657_p11, %p656_p8 }
 0x1c1   : > { %p659_p3 = pnand %p658_p1, %p652_p10 }
 0x1c3   : > { %662 = shalt.err (!%p659_p3)
}
 0x1c4   : > { %486 = dma.vmem_to_hbm [thread:$0]  (%p988_p0), %s929_s26, 128, %s927_s30, %s316_s4  }
 0x1c5 PF: > { %s341_s29 = sand.u32 1, %s693_s12   ;;  %p989_p7 = scmp.ne.s32.totalorder %s979_s19, 0 }
 0x1c6   : > { %p990_p9 = scmp.ge.s32.totalorder %s705_s15, 2  ;;  %s342_s18 = scalar_lea.sflag [#allocation4], %s341_s29 }
 0x1c8   : > { %p500_p12 = pnand %p990_p9, %p989_p7 }
 0x1ca   : > { %688 = dma.done.wait (!%p500_p12), %s342_s18, 128  }
 0x1cb   : > { %690 = vsyncadd (!%p500_p12), %s342_s18, 4294967168  ;;  %p17_p2 = scmp.ge.s32.totalorder %s848_s5, 4   ;;  %s991_s12 = smov %s697_s13 }
 0x1cc   : > { %s992_s13 = smov %s701_s14  ;;  %s993_s14 = smov %s864_s8 }
 0x1cd   : > { %s994_s15 = smov %s848_s5  ;;  %19 = sbr.rel (!%p17_p2) target bundleno = 6 (0x6), region = 85 }
 0x1d4   :  { %347 = vsyncpa [#allocation3], 1 }
 0x1d5   :  { %349 = vsyncpa [#allocation3 + $0x1], 1 }
 0x1d6   :  { %350 = vsyncpa [#allocation6], 1 }
 0x1d7   :  { %351 = vsyncpa [#allocation4], 1 }
 0x1d8   :  { %353 = vsyncpa [#allocation4 + $0x1], 1 }

// kernel: gat_self_attention_forward.4
= control target key start
LH: loop header
LB: loop body
LE: loop exit
PB: predicated region body
PF: predicated region fallthrough
CT: control target
= control target key end

     0   :  { %s1827_s0 = inlined_call_operand.hbm [shape: f32[2,4,8,16], index: 0, kind: input, shape index: {}]   ;;  %s1828_s1 = inlined_call_operand.hbm [shape: f32[2,4,8,8], index: 1, kind: input, shape index: {}]   ;;  %s1829_s2 = inlined_call_operand.hbm [shape: f32[16,8], index: 2, kind: input, shape index: {}]   ;;  %s1830_s3 = inlined_call_operand.hbm [shape: f32[2,8,32], index: 3, kind: output, shape index: {}]  }
   0x1   :  { %1838 = sst [smem:[#allocation13_spill]] %s1827_s0 }
   0x2   :  { %1839 = sst [smem:[#allocation14_spill]] %s1829_s2 }
   0x3   :  { %8 = vsyncpa [#allocation3], 0 }
   0x4   :  { %10 = vsyncpa [#allocation3 + $0x1], 0 }
   0x5   :  { %11 = vsyncpa [#allocation6], 0 }
   0x6   :  { %13 = vsyncpa [#allocation6 + $0x1], 0 }
   0x7   :  { %14 = vsyncpa [#allocation4], 0 }
   0x8   :  { %16 = vsyncpa [#allocation4 + $0x1], 0  ;;  %s1499_s12 = smov 0   ;;  %s1501_s13 = smov 0  }
   0x9   :  { %s1503_s14 = smov 0   ;;  %s1505_s15 = smov 0  }
   0xa   :  { %s1507_s16 = smov 0   ;;  %s1509_s17 = smov 0  }
   0xb LB: > { %s1530_s18 = sadd.s32 4294967295, %s1465_s17   ;;  %s1070_s19 = sadd.s32 4294967294, %s1465_s17   ;;  %s1465_s17 = sphi %s1509_s17, %s22_s17   ;;  %s1461_s16 = sphi %s1507_s16, %s1862_s16   ;;  %s1457_s15 = sphi %s1505_s15, %s1861_s15   ;;  %s1453_s14 = sphi %s1503_s14, %s1860_s14   ;;  %s1449_s13 = sphi %s1501_s13, %s1859_s13   ;;  %s1445_s12 = sphi %s1499_s12, %s1858_s12  }
   0xc   : > { %p56_p0 = scmp.ne.s32.totalorder %s1449_s13, %s1445_s12  ;;  %p1831_p1 = scmp.eq.s32.totalorder %s1530_s18, 0 }
   0xd   : > { %p135_p3 = scmp.eq.s32.totalorder %s1070_s19, 1  ;;  %p1071_p5 = scmp.ge.s32.totalorder %s1465_s17, 1 }
   0xe   : > { %p1539_p4 = por %p1831_p1, %p56_p0  ;;  %p142_p7 = scmp.lt.s32.totalorder %s1465_s17, 3 }
   0xf   : > { %p1544_p6 = por %p135_p3, %p56_p0  ;;  %s1467_s23 = smov [#allocation7]  }
  0x10   : > { %s1840_s20 = scalar_select %p1539_p4, 1, 0 }
  0x11   : > { %s1841_s21 = scalar_select %p1544_p6, 1, 0 }
  0x12   : > { %p1549_p8 = pnand %p1071_p5, %p142_p7  ;;  %s154_s24 = sshll.u32 %s1467_s23, 4  ;;  %s155_s24 = int_to_ptr.vmem [resolvable:$true] %s154_s24 }
  0x13   : > { %s34_s26 = sadd.s32 1, %s1461_s16  ;;  %s1844_s2 = sld [smem:[#allocation14_spill]] }
  0x14   : > { %s1842_s22 = scalar_select %p1549_p8, 1, 0 }
  0x15   : > { %p1195_p9 = pneg %p1549_p8 }
  0x17   : > { %p1558_p11 = pnand %p1195_p9, %p1831_p1 }
  0x19   : > { %s1287_s29 = scalar_lea.hbm %s1844_s2, 256  ;;  %p1289_p13 = pneg %p1558_p11 }
  0x1a   : > { %p1288_p12 = scmp.ne.s32.totalorder %s1844_s2, %s1287_s29  ;;  %p1294_p5 = scmp.lt.u32.totalorder %s1287_s29, %s1844_s2 }
  0x1c   : > { %p1290_p0 = pnand %p1289_p13, %p1288_p12 }
  0x1e   : > { %p1291_p3 = pneg %p1290_p0 }
  0x20   : > { %p1296_p7 = pnand %p1294_p5, %p1291_p3 }
  0x22   : > { %1299 = shalt.err (!%p1296_p7)
}
  0x23   : > { %s1300_s7 = scalar_lea.vmem %s155_s24, 256  ;;  %p1308_p2 = scmp.lt.s32.totalorder %s155_s24, %s155_s24 }
  0x24   : > { %p1301_p9 = scmp.ne.s32.totalorder %s155_s24, %s1300_s7  ;;  %p1309_p6 = scmp.lt.s32.totalorder %s1300_s7, %s1300_s7 }
  0x26   : > { %p1303_p10 = pnand %p1301_p9, %p1289_p13  ;;  %p1310_p4 = por %p1309_p6, %p1308_p2 }
  0x28   : > { %p1304_p1 = pneg %p1303_p10 }
  0x2a   : > { %p1311_p8 = pnand %p1310_p4, %p1304_p1 }
  0x2c   : > { %1314 = shalt.err (!%p1311_p8)
}
  0x2d   : > { %s1834_s8 = smov 128   ;;  %s1836_s9 = smov 8  }
  0x2e   : > { %1198 = dma.hbm_to_vmem [thread:$0]  (!%p1558_p11), %s1844_s2, 256, %s155_s24, [#allocation6], %s1834_s8, %s1834_s8, %s1836_s9  }
  0x2f   : > { %p36_p1 = scmp.ge.s32.totalorder %s34_s26, 2  ;;  %s43_s19 = sadd.s32 1, %s1453_s14 }
  0x30   : > { %p50_p2 = scmp.ne.s32.totalorder %s1453_s14, %s1449_s13  ;;  %p51_p4 = scmp.eq.s32.totalorder %s1465_s17, 0 }
  0x31   : > { %s1864_s26 = smov (%p36_p1, %s34_s26), 0  ;;  %p1846_p8 = scmp.eq.s32.totalorder %s1530_s18, 1 }
  0x32   : > { %p1588_p6 = por %p51_p4, %p50_p2  ;;  %s38_s27 = ssub.s32 %s1461_s16, %s1864_s26 }
  0x33   : > { %p1594_p10 = por %p1846_p8, %p50_p2  ;;  %p1211_p12 = scmp.lt.s32.totalorder %s1465_s17, 2 }
  0x34   : > { %p41_p11 = scmp.eq.s32.totalorder %s38_s27, 0  ;;  %s168_s24 = sand.u32 1, %s1453_s14  }
  0x35   : > { %s1074_s28 = sshll.u32 %s168_s24, 5  ;;  %s1103_s30 = sshll.u32 %s1461_s16, 9 }
  0x36   : > { %s1603_s29 = scalar_select %p41_p11, %s1453_s14, %s43_s19  }
  0x37   : > { %s1848_s0 = sld [smem:[#allocation13_spill]]  ;;  %s172_s7 = scalar_lea.vmem [#allocation2], %s1074_s28 }
  0x38   : > { %s180_s10 = sshll.u32 %s172_s7, 4  ;;  %p1615_p13 = pnand %p1211_p12, %p1588_p6  ;;  %s1611_s10 = int_to_ptr.vmem [resolvable:$true] %s180_s10 }
  0x39   : > { %s1622_s4 = scalar_lea.hbm %s1828_s1, %s1103_s30  ;;  %s194_s5 = scalar_lea.vmem [#allocation5], %s1074_s28 }
  0x3a   : > { %s1624_s8 = sshll.u32 %s194_s5, 4  ;;  %s1626_s9 = scalar_lea.sflag [#allocation3], %s168_s24  ;;  %s1658_s8 = int_to_ptr.vmem [resolvable:$true] %s1624_s8 }
  0x3b   : > { %p1317_p3 = pneg %p1615_p13 }
  0x3d   : > { %s1609_s6 = scalar_lea.hbm %s1848_s0, %s1103_s30  ;;  %s1320_s19 = scalar_lea.hbm %s1848_s0, 1024 }
  0x3e   : > { %s1315_s7 = scalar_lea.hbm %s1609_s6, 512  ;;  %p1321_p9 = scmp.lt.u32.totalorder %s1609_s6, %s1848_s0 }
  0x3f   : > { %p1316_p0 = scmp.ne.s32.totalorder %s1609_s6, %s1315_s7  ;;  %p1322_p1 = scmp.lt.u32.totalorder %s1320_s19, %s1315_s7 }
  0x40   : > { %p1324_p4 = scmp.lt.u32.totalorder %s1315_s7, %s1609_s6 }
  0x41   : > { %p1318_p5 = pnand %p1317_p3, %p1316_p0  ;;  %p1323_p2 = por %p1322_p1, %p1321_p9 }
  0x43   : > { %p1319_p7 = pneg %p1318_p5  ;;  %p1325_p6 = por %p1324_p4, %p1323_p2 }
  0x45   : > { %p1326_p8 = pnand %p1325_p6, %p1319_p7 }
  0x47   : > { %1329 = shalt.err (!%p1326_p8)
}
  0x48   : > { %s1330_s24 = scalar_lea.vmem %s1611_s10, 512  ;;  %s1470_s2 = smov [#allocation2]  }
  0x49   : > { %p1331_p12 = scmp.ne.s32.totalorder %s1611_s10, %s1330_s24  ;;  %s1335_s28 = sshll.u32 %s1470_s2, 4  ;;  %s1336_s28 = int_to_ptr.vmem [resolvable:$false] %s1335_s28 }
  0x4a   : > { %s1337_s5 = scalar_lea.vmem %s1336_s28, 1024  ;;  %p1338_p5 = scmp.lt.s32.totalorder %s1611_s10, %s1336_s28 }
  0x4b   : > { %p1333_p11 = pnand %p1331_p12, %p1317_p3  ;;  %p1339_p9 = scmp.lt.s32.totalorder %s1337_s5, %s1330_s24 }
  0x4d   : > { %p1334_p0 = pneg %p1333_p11  ;;  %p1340_p1 = por %p1339_p9, %p1338_p5 }
  0x4f   : > { %p1341_p2 = pnand %p1340_p1, %p1334_p0 }
  0x51   : > { %1344 = shalt.err (!%p1341_p2)
}
  0x52   : > { %s1850_s7 = smov 8   ;;  %s1851_s23 = smov 128  }
  0x53   : > { %1202 = dma.hbm_to_vmem [thread:$0]  (!%p1615_p13), %s1609_s6, 512, %s1611_s10, %s1626_s9, %s1851_s23, %s1851_s23, %s1850_s7  }
  0x54   : > { %s190_s19 = sand.u32 1, %s1465_s17   ;;  %s1345_s30 = scalar_lea.hbm %s1622_s4, 512 }
  0x55   : > { %s1661_s27 = scalar_lea.sflag [#allocation6], %s190_s19  ;;  %p1346_p7 = scmp.ne.s32.totalorder %s1622_s4, %s1345_s30 }
  0x56   : > { %s1350_s28 = scalar_lea.hbm %s1828_s1, 1024  ;;  %p1351_p8 = scmp.lt.u32.totalorder %s1622_s4, %s1828_s1 }
  0x57   : > { %p1348_p4 = pnand %p1346_p7, %p1317_p3  ;;  %p1352_p12 = scmp.lt.u32.totalorder %s1350_s28, %s1345_s30 }
  0x58   : > { %p1354_p0 = scmp.lt.u32.totalorder %s1345_s30, %s1622_s4 }
  0x59   : > { %p1349_p6 = pneg %p1348_p4  ;;  %p1353_p11 = por %p1352_p12, %p1351_p8 }
  0x5b   : > { %p1355_p5 = por %p1354_p0, %p1353_p11 }
  0x5d   : > { %p1356_p9 = pnand %p1355_p5, %p1349_p6 }
  0x5f   : > { %1359 = shalt.err (!%p1356_p9)
}
  0x60   : > { %s1360_s9 = scalar_lea.vmem %s1658_s8, 512  ;;  %s1471_s6 = smov [#allocation5]  }
  0x61   : > { %p1361_p1 = scmp.ne.s32.totalorder %s1658_s8, %s1360_s9  ;;  %s1365_s10 = sshll.u32 %s1471_s6, 4  ;;  %s1366_s10 = int_to_ptr.vmem [resolvable:$false] %s1365_s10 }
  0x62   : > { %s1367_s0 = scalar_lea.vmem %s1366_s10, 1024  ;;  %p1368_p4 = scmp.lt.s32.totalorder %s1658_s8, %s1366_s10 }
  0x63   : > { %p1363_p2 = pnand %p1361_p1, %p1317_p3  ;;  %p1369_p8 = scmp.lt.s32.totalorder %s1367_s0, %s1360_s9 }
  0x65   : > { %p1364_p7 = pneg %p1363_p2  ;;  %p1370_p12 = por %p1369_p8, %p1368_p4 }
  0x67   : > { %p1371_p11 = pnand %p1370_p12, %p1364_p7 }
  0x69   : > { %1374 = shalt.err (!%p1371_p11)
}
  0x6a   : > { %1205 = dma.hbm_to_vmem [thread:$0]  (!%p1615_p13), %s1622_s4, 512, %s1658_s8, %s1661_s27, %s1851_s23, %s1851_s23, %s1850_s7  }
  0x6b   : > { %p1852_p3 = scmp.ne.s32.totalorder %s1842_s22, 0 }
  0x6c   : > { %s1693_s19 = sand.u32 (!%p1852_p3), 1, %s1449_s13   ;;  %p1853_p6 = scmp.ne.s32.totalorder (!%p1852_p3), %s1840_s20, 0 }
  0x6d   : > { %213 = sbr.rel (%p1852_p3) target bundleno = 1230 (0x4ce), region = 32  ;;  %s1081_s30 = sshll.u32 (!%p1852_p3), %s1693_s19, 5 }
  0x6e   : > { %s216_s24 = scalar_lea.sflag (!%p1852_p3), [#allocation3], %s1693_s19  ;;  %s1697_s2 = scalar_lea.vmem (!%p1852_p3), [#allocation2], %s1081_s30 }
  0x74   : > { %1428 = dma.done.wait (%p1853_p6), %s216_s24, 512  }
  0x75   : > { %1430 = vsyncadd (%p1853_p6), %s216_s24, 4294966784  ;;  %s224_s8 = sand.u32 1, %s1530_s18   ;;  %s1704_s11 = scalar_lea.vmem [#allocation5], %s1081_s30 }
  0x76   : > { %s225_s22 = scalar_lea.sflag [#allocation6], %s224_s8 }
  0x77   : > { %1432 = dma.done.wait (%p1853_p6), %s225_s22, 512  }
  0x78   : > { %1434 = vsyncadd (%p1853_p6), %s225_s22, 4294966784  ;;  %p1854_p13 = scmp.eq.s32.totalorder %s1530_s18, 0 }
  0x7a   : > { %1436 = dma.done.wait (%p1854_p13), [#allocation6], 256   ;;  %p1855_p0 = pmov %p1854_p13 }
  0x7b   : > { %v1472_v0 = vmov 0.0|0.0   ;;  %vm1473_vm0 = vmmov 0   ;;  %v1474_v1 = vmov 0.0   ;;  %v260_v2 = vld [vmem:[#allocation7] sm:$0xff]  ;;  %v261_v3 = vld [vmem:[#allocation7 + $0x8] sm:$0xff]  ;;  %vm263_vm1 = vcmask 130048  }
  0x7c   : > { %1438 = vsyncadd (%p1855_p0), [#allocation6], 4294967040  ;;  %1173 = vmatprep.subr.bf16.mxu0 %v1472_v0  ;;  %1129 = vmatprep.mubr.msk.f32.mxu0 %vm1473_vm0, %v1474_v1  ;;  %v1174_v4 = vpack.c.bf16 %v261_v3, %v260_v2  ;;  %v262_v5 = vld [vmem:[%s1697_s2] sm:$0xff]  ;;  %vm340_vm3 = vcmask 64512   ;;  %v1087_v16 = vld [vmem:[%s1697_s2 + $0x8] sm:$0xff]  ;;  %s1084_s18 = sshll.u32 %s1693_s19, 3 }
  0x7d   : > { %1132 = vmatprep.subr.mxu1 %v1474_v1  ;;  %1134 = vmatprep.mubr.msk.f32.mxu1 %vm1473_vm0, %v1474_v1  ;;  %v352_v11 = vld [vmem:[%s1704_s11] sm:$0xff]  ;;  %v1091_v17 = vld [vmem:[%s1697_s2 + $0x10] sm:$0xff]  ;;  %v1095_v18 = vld [vmem:[%s1697_s2 + $0x18] sm:$0xff]  ;;  %s1766_s20 = scalar_lea.vmem [#allocation8], %s1084_s18  ;;  %s1475_s4 = smov 8   ;;  %vm597_vm7 = vcmask 130112  }
  0x7e   : > { %1175 = vmatpush3.bf16.msra.mxu0 %v1174_v4  ;;  %1133 = vmatpush3.msra.mxu1 %v352_v11  ;;  %v1089_v36 = vld [vmem:[%s1704_s11 + $0x8] sm:$0xff]  ;;  %v1093_v46 = vld [vmem:[%s1704_s11 + $0x10] sm:$0xff]  ;;  %v1097_v49 = vld [vmem:[%s1704_s11 + $0x18] sm:$0xff]  ;;  %s1476_s7 = smov 16   ;;  %s1477_s23 = smov 24   ;;  %vm768_vm8 = vcmask 195712  }
  0x7f   : > { %1144 = vmatprep.subr.mxu0 %v1474_v1  ;;  %1176 = vmatprep.subr.bf16.mxu1 %v1472_v0  ;;  %s1100_s27 = sshll.u32 %s1457_s15, 7  ;;  %s956_s28 = sshll.u32 %s1766_s20, 4  ;;  %vm939_vm9 = vcmask 261312   ;;  %s1779_s28 = int_to_ptr.vmem [resolvable:$true] %s956_s28 }
  0x80   : > { %s1777_s6 = scalar_lea.hbm %s1830_s3, %s1100_s27  ;;  %s942_s10 = scalar_lea.sflag [#allocation4], %s1693_s19 }
  0x81   : > { %1130 = vmatmul.mubr.msk.f32.vlgmr.msra.gmra.mrb[0].mxu0 %vm263_vm1, %v262_v5  ;;  %s1375_s0 = scalar_lea.vmem %s1779_s28, 128  ;;  %s1478_s15 = smov [#allocation8]  }
  0x82   : > { %1146 = vmatprep.mubr.msk.f32.mxu0 %vm1473_vm0, %v1474_v1  ;;  %1145 = vmatpush3.msra.mxu0 %v1089_v36  ;;  %p1376_p5 = scmp.ne.s32.totalorder %s1779_s28, %s1375_s0  ;;  %s1379_s30 = sshll.u32 %s1478_s15, 4  ;;  %s1380_s30 = int_to_ptr.vmem [resolvable:$false] %s1379_s30 }
  0x83   : > { %1156 = vmatprep.subr.mxu0 %v1474_v1  ;;  %s1381_s24 = scalar_lea.vmem %s1380_s30, 256  ;;  %p1382_p2 = scmp.lt.s32.totalorder %s1779_s28, %s1380_s30 }
  0x84   : > { %p1377_p9 = pnand %p1376_p5, %p1594_p10  ;;  %p1383_p7 = scmp.lt.s32.totalorder %s1381_s24, %s1375_s0 }
  0x86   : > { %p1378_p1 = pneg %p1377_p9  ;;  %p1384_p4 = por %p1383_p7, %p1382_p2 }
  0x88   : > { %p1385_p8 = pnand %p1384_p4, %p1378_p1 }
 0x154   : > { %v333_v6 = vpop.f32.mrb[0].mxu0 }
 0x155   : > { %v338_v7 = vmul.f32 0.01, %v333_v6  ;;  %v1131_v8 = vpop.f32.mrb[1].mxu0  ;;  %vm337_vm2 = vcmp.ge.f32.partialorder %v333_v6, 0.0 }
 0x157   : > { %v339_v9 = vsel %vm337_vm2, %v333_v6, %v338_v7 }
 0x158   : > { %v341_v10 = vsel %vm340_vm3, %v339_v9, -inf }
 0x159   : > { %342 = vmax.xlane.f32.xlu0 %v341_v10 }
 0x1e6   : > { %v343_v12 = vpop.xlane.xlu0 %342 }
 0x1e7   : > { %v344_v13 = vsub.f32 %v339_v9, %v343_v12 }
 0x1e9   : > { %v345_v14 = vmul.f32 1.442695, %v344_v13 }
 0x1eb   : > { %1271 = vpow2.f32 %v345_v14 }
 0x1f5   : > { %v1726_v15 = vpop.eup %1271 }
 0x1f6   : > { %1135 = vmatmul.mubr.msk.f32.vlgmr.msra.gmra.mrb[0].mxu1 %vm340_vm3, %v1726_v15  ;;  %v347_v54 = vsel %vm340_vm3, %v1726_v15, 0.0 }
 0x1f7   : > { %1178 = vmatpush3.bf16.msra.mxu1 %v1174_v4  ;;  %1141 = vmatprep.mubr.msk.f32.mxu1 %vm1473_vm0, %v1474_v1 }
 0x1f8   : > { %1179 = vmatprep.subr.bf16.mxu1 %v1472_v0 }
 0x1fa   : > { %1142 = vmatmul.mubr.msk.f32.vlgmr.msra.gmra.mrb[2].mxu1 %vm263_vm1, %v1087_v16 }
 0x1fb   : > { %1181 = vmatpush3.bf16.msra.mxu1 %v1174_v4  ;;  %1153 = vmatprep.mubr.msk.f32.mxu1 %vm1473_vm0, %v1474_v1 }
 0x1fc   : > { %1182 = vmatprep.subr.bf16.mxu1 %v1472_v0 }
 0x1fe   : > { %1154 = vmatmul.mubr.msk.f32.vlgmr.msra.gmra.mrb[4].mxu1 %vm263_vm1, %v1091_v17 }
 0x1ff   : > { %1184 = vmatpush3.bf16.msra.mxu1 %v1174_v4  ;;  %1165 = vmatprep.mubr.msk.f32.mxu1 %vm1473_vm0, %v1474_v1 }
 0x202   : > { %1166 = vmatmul.mubr.msk.f32.vlgmr.msra.gmra.mrb[6].mxu1 %vm263_vm1, %v1095_v18 }
 0x2c9   : > { %v1742_v19 = vpop.f32.mrb[0].mxu1 }
 0x2ca   : > { %v1136_v20 = vpop.f32.mrb[1].mxu1 }
 0x2cd   : > { %v499_v21 = vpop.f32.mrb[2].mxu1 }
 0x2ce   : > { %vm503_vm4 = vcmp.ge.f32.partialorder %v499_v21, 0.0  ;;  %v504_v22 = vmul.f32 0.01, %v499_v21  ;;  %v1143_v23 = vpop.f32.mrb[3].mxu1 }
 0x2d0   : > { %v505_v24 = vsel %vm503_vm4, %v499_v21, %v504_v22 }
 0x2d1   : > { %v670_v25 = vpop.f32.mrb[4].mxu1  ;;  %v506_v26 = vsel %vm340_vm3, %v505_v24, -inf }
 0x2d2   : > { %v675_v27 = vmul.f32 0.01, %v670_v25  ;;  %507 = vmax.xlane.f32.xlu0 %v506_v26  ;;  %v1155_v28 = vpop.f32.mrb[5].mxu1  ;;  %vm674_vm5 = vcmp.ge.f32.partialorder %v670_v25, 0.0 }
 0x2d4   : > { %v676_v29 = vsel %vm674_vm5, %v670_v25, %v675_v27 }
 0x2d5   : > { %v841_v30 = vpop.f32.mrb[6].mxu1  ;;  %v677_v31 = vsel %vm340_vm3, %v676_v29, -inf }
 0x2d6   : > { %vm845_vm6 = vcmp.ge.f32.partialorder %v841_v30, 0.0  ;;  %v846_v32 = vmul.f32 0.01, %v841_v30  ;;  %678 = vmax.xlane.f32.xlu1 %v677_v31  ;;  %v1167_v33 = vpop.f32.mrb[7].mxu1 }
 0x2d8   : > { %v847_v34 = vsel %vm845_vm6, %v841_v30, %v846_v32 }
 0x2d9   : > { %v848_v35 = vsel %vm340_vm3, %v847_v34, -inf }
 0x2da   : > { %849 = vmax.xlane.f32.xlu1 %v848_v35 }
 0x35f   : > { %v508_v37 = vpop.xlane.xlu0 %507 }
 0x360   : > { %v509_v38 = vsub.f32 %v505_v24, %v508_v37 }
 0x362   : > { %v510_v39 = vmul.f32 1.442695, %v509_v38 }
 0x363   : > { %v679_v40 = vpop.xlane.xlu1 %678 }
 0x364   : > { %1273 = vpow2.f32 %v510_v39  ;;  %v680_v41 = vsub.f32 %v676_v29, %v679_v40 }
 0x366   : > { %v681_v42 = vmul.f32 1.442695, %v680_v41 }
 0x367   : > { %v850_v43 = vpop.xlane.xlu1 %849 }
 0x368   : > { %1275 = vpow2.f32 %v681_v42  ;;  %v851_v44 = vsub.f32 %v847_v34, %v850_v43 }
 0x36a   : > { %v852_v45 = vmul.f32 1.442695, %v851_v44 }
 0x36c   : > { %1277 = vpow2.f32 %v852_v45 }
 0x36e   : > { %v1274_v47 = vpop.eup %1273 }
 0x36f   : > { %1147 = vmatmul.mubr.msk.f32.vlgmr.msra.gmra.mrb[2].mxu0 %vm340_vm3, %v1274_v47  ;;  %v512_v48 = vsel %vm340_vm3, %v1274_v47, 0.0 }
 0x370   : > { %1157 = vmatpush3.msra.mxu0 %v1093_v46  ;;  %513 = vadd.xlane.f32.xlu0 %v512_v48 }
 0x371   : > { %1158 = vmatprep.mubr.msk.f32.mxu0 %vm1473_vm0, %v1474_v1  ;;  %1168 = vmatprep.subr.mxu0 %v1474_v1 }
 0x372   : > { %v1276_v50 = vpop.eup %1275 }
 0x373   : > { %1159 = vmatmul.mubr.msk.f32.vlgmr.msra.gmra.mrb[4].mxu0 %vm340_vm3, %v1276_v50  ;;  %v683_v51 = vsel %vm340_vm3, %v1276_v50, 0.0 }
 0x374   : > { %1169 = vmatpush3.msra.mxu0 %v1097_v49  ;;  %684 = vadd.xlane.f32.xlu1 %v683_v51 }
 0x375   : > { %1170 = vmatprep.mubr.msk.f32.mxu0 %vm1473_vm0, %v1474_v1 }
 0x376   : > { %v1278_v52 = vpop.eup %1277 }
 0x377   : > { %1171 = vmatmul.mubr.msk.f32.vlgmr.msra.gmra.mrb[6].mxu0 %vm340_vm3, %v1278_v52  ;;  %v854_v53 = vsel %vm340_vm3, %v1278_v52, 0.0 }
 0x378   : > { %855 = vadd.xlane.f32.xlu0 %v854_v53  ;;  %348 = vadd.xlane.f32.xlu1 %v347_v54 }
 0x3fd   : > { %v514_v59 = vpop.xlane.xlu0 %513 }
 0x401   : > { %v685_v55 = vpop.xlane.xlu1 %684 }
 0x405   : > { %v349_v56 = vpop.xlane.xlu1 %348  ;;  %v856_v60 = vpop.xlane.xlu0 %855 }
 0x406   : > { %1279 = vrcp.f32 %v349_v56 }
 0x407   : > { %1281 = vrcp.f32 %v514_v59 }
 0x408   : > { %1283 = vrcp.f32 %v685_v55 }
 0x409   : > { %1285 = vrcp.f32 %v856_v60 }
 0x410   : > { %v1280_v57 = vpop.eup %1279 }
 0x411   : > { %v426_v58 = vmul.f32 %v1280_v57, %v1742_v19  ;;  %v1282_v61 = vpop.eup %1281 }
 0x412   : > { %v1284_v1 = vpop.eup %1283 }
 0x413   : > { %427 = vst.msk [vmem:[%s1766_s20] sm:$0xff] %vm340_vm3, %v426_v58  ;;  %v1286_v5 = vpop.eup %1285 }
 0x442   : > { %v588_v62 = vpop.f32.mrb[2].mxu0 }
 0x443   : > { %v592_v63 = vmul.f32 %v1282_v61, %v588_v62  ;;  %v1148_v0 = vpop.f32.mrb[3].mxu0 }
 0x445   : > { %594 = vrot.lane.b32.xlu0 %v592_v63, %s1475_s4 }
 0x446   : > { %v759_v2 = vpop.f32.mrb[4].mxu0 }
 0x447   : > { %v763_v3 = vmul.f32 %v1284_v1, %v759_v2  ;;  %v1160_v4 = vpop.f32.mrb[5].mxu0 }
 0x449   : > { %765 = vrot.lane.b32.xlu1 %v763_v3, %s1476_s7 }
 0x44a   : > { %v930_v6 = vpop.f32.mrb[6].mxu0 }
 0x44b   : > { %v934_v7 = vmul.f32 %v1286_v5, %v930_v6  ;;  %v1172_v8 = vpop.f32.mrb[7].mxu0 }
 0x44d   : > { %936 = vrot.lane.b32.xlu1 %v934_v7, %s1477_s23 }
 0x4b7   : > { %v595_v9 = vpop.permute.xlu0 %594 }
 0x4b8   : > { %598 = vst.msk [vmem:[%s1766_s20] sm:$0xff] %vm597_vm7, %v595_v9 }
 0x4bb   : > { %v766_v10 = vpop.permute.xlu1 %765 }
 0x4bc   : > { %769 = vst.msk [vmem:[%s1766_s20] sm:$0xff] %vm768_vm8, %v766_v10 }
 0x4bf   : > { %v937_v11 = vpop.permute.xlu1 %936 }
 0x4c0   : > { %940 = vst.msk [vmem:[%s1766_s20] sm:$0xff] %vm939_vm9, %v937_v11 }
 0x4c1   : > { %1388 = shalt.err (!%p1385_p8)
}
 0x4c2   : > { %s1389_s19 = scalar_lea.hbm %s1777_s6, 128  ;;  %s1393_s22 = scalar_lea.hbm %s1830_s3, 256 }
 0x4c3   : > { %p1390_p12 = scmp.ne.s32.totalorder %s1777_s6, %s1389_s19  ;;  %p1394_p6 = scmp.lt.u32.totalorder %s1777_s6, %s1830_s3 }
 0x4c4   : > { %p1395_p13 = scmp.lt.u32.totalorder %s1393_s22, %s1389_s19  ;;  %p1397_p5 = scmp.lt.u32.totalorder %s1389_s19, %s1777_s6 }
 0x4c5   : > { %p1391_p11 = pnand %p1390_p12, %p1594_p10 }
 0x4c6   : > { %p1396_p0 = por %p1395_p13, %p1394_p6 }
 0x4c7   : > { %p1392_p3 = pneg %p1391_p11 }
 0x4c8   : > { %p1398_p9 = por %p1397_p5, %p1396_p0 }
 0x4ca   : > { %p1399_p1 = pnand %p1398_p9, %p1392_p3 }
 0x4cc   : > { %1402 = shalt.err (!%p1399_p1)
}
 0x4cd   : > { %1193 = dma.vmem_to_hbm [thread:$0]  (%p1594_p10), %s1779_s28, 128, %s1777_s6, %s942_s10  }
 0x4ce PF: > { %s968_s20 = sand.u32 1, %s1445_s12   ;;  %p1856_p2 = scmp.ne.s32.totalorder %s1841_s21, 0 }
 0x4cf   : > { %p1857_p7 = scmp.ge.s32.totalorder %s1465_s17, 2  ;;  %s969_s4 = scalar_lea.sflag [#allocation4], %s968_s20 }
 0x4d1   : > { %p1207_p4 = pnand %p1857_p7, %p1856_p2 }
 0x4d3   : > { %1440 = dma.done.wait (!%p1207_p4), %s969_s4, 128  }
 0x4d4   : > { %1442 = vsyncadd (!%p1207_p4), %s969_s4, 4294967168  ;;  %s22_s17 = sadd.s32 1, %s1465_s17   ;;  %s1858_s12 = smov %s1449_s13 }
 0x4d5   : > { %p19_p8 = scmp.ge.s32.totalorder %s22_s17, 4   ;;  %s1859_s13 = smov %s1453_s14 }
 0x4d6   : > { %s1860_s14 = smov %s1603_s29  ;;  %s1861_s15 = smov %s1461_s16 }
 0x4d7   : > { %s1862_s16 = smov %s1864_s26  ;;  %21 = sbr.rel (!%p19_p8) target bundleno = 11 (0xb), region = 100 }
 0x4de   :  { %974 = vsyncpa [#allocation3], 1 }
 0x4df   :  { %976 = vsyncpa [#allocation3 + $0x1], 1 }
 0x4e0   :  { %977 = vsyncpa [#allocation6], 1 }
 0x4e1   :  { %979 = vsyncpa [#allocation6 + $0x1], 1 }
 0x4e2   :  { %980 = vsyncpa [#allocation4], 1 }
 0x4e3   :  { %982 = vsyncpa [#allocation4 + $0x1], 1 }

</bundles_post_ra>
